<compile_context>
chip_gen: v5e
topology: v5e:2x2
jax: 0.10.0
libtpu: 0.0.40
codegen_flags: <defaults>
</compile_context>

<pallas_src>
import jax
import jax.numpy as jnp
from jax.experimental import pallas as pl
from jax.experimental.pallas import tpu as pltpu

# Small, module-consistent sizes (the module hard-codes hidden = 512).
D_HALF = 128                  # x and y are each (B, D_HALF)
INPUT_DIM = 2 * D_HALF        # fused feature dim
HIDDEN = 512                  # nn.LSTM hidden size (fixed in the module)
THREE_H = 3 * HIDDEN          # pruned gate width: [i | g | o]
OUTPUT_DIM = 100              # fc_out output dim
O_PAD = 128                   # lane-dense padded output width
BATCH = 2

_VMEM_SPEC = pl.BlockSpec(memory_space=pltpu.MemorySpace.VMEM)


def _gates_to_h(gates):
    """gates: (B, 3H) f32 with columns ordered [i | g | o] (forget gate pruned)."""
    H = HIDDEN
    i_g = jax.nn.sigmoid(gates[:, 0:H])
    g_g = jnp.tanh(gates[:, H:2 * H])
    o_g = jax.nn.sigmoid(gates[:, 2 * H:3 * H])
    # c = sigmoid(i) * tanh(g)   (forget-gate term vanishes since c0 == 0)
    return o_g * jnp.tanh(i_g * g_g)


def _fused_mode0_kernel(x_ref, y_ref, wtop_ref, wbot_ref, b_ref,
                        wfc_ref, bfc_ref, out_ref):
    """mode == 0: gates = x @ W_top + y @ W_bot + b (== cat(x, y) @ W_ih^T + b)."""
    gates = (
        jnp.dot(x_ref[...].astype(jnp.bfloat16), wtop_ref[...],
                preferred_element_type=jnp.float32)
        + jnp.dot(y_ref[...].astype(jnp.bfloat16), wbot_ref[...],
                  preferred_element_type=jnp.float32)
        + b_ref[...]
    )
    h = _gates_to_h(gates)
    out = jnp.dot(h.astype(jnp.bfloat16), wfc_ref[...],
                  preferred_element_type=jnp.float32) + bfc_ref[...]
    out_ref[...] = out.astype(out_ref.dtype)


def _fused_mode1_kernel(x_ref, y_ref, wtop_ref, wbot_ref, b_ref,
                        wfc_ref, bfc_ref, outx_ref, outy_ref):
    """mode != 0: both zero-padded branches in ONE call, sharing the weight DMA.

    feature_x = cat(x, 0)  ->  gates_x = x @ W_top + b
    feature_y = cat(0, y)  ->  gates_y = y @ W_bot + b
    """
    gx = jnp.dot(x_ref[...].astype(jnp.bfloat16), wtop_ref[...],
                 preferred_element_type=jnp.float32) + b_ref[...]
    gy = jnp.dot(y_ref[...].astype(jnp.bfloat16), wbot_ref[...],
                 preferred_element_type=jnp.float32) + b_ref[...]
    hx = _gates_to_h(gx)
    hy = _gates_to_h(gy)
    wfc = wfc_ref[...]
    bfc = bfc_ref[...]
    outx_ref[...] = (jnp.dot(hx.astype(jnp.bfloat16), wfc,
                             preferred_element_type=jnp.float32) + bfc
                     ).astype(outx_ref.dtype)
    outy_ref[...] = (jnp.dot(hy.astype(jnp.bfloat16), wfc,
                             preferred_element_type=jnp.float32) + bfc
                     ).astype(outy_ref.dtype)


def lstm_fusion_forward(x, y, mode, params):
    """JAX-side glue reproducing LSTMFusion.forward (mode is a static Python int)."""
    w_top, w_bot, bias, w_fc_pad, b_fc_pad = params
    B = x.shape[0]
    if mode == 0:
        out = pl.pallas_call(
            _fused_mode0_kernel,
            out_shape=jax.ShapeDtypeStruct((B, O_PAD), jnp.float32),
            in_specs=[_VMEM_SPEC] * 7,
            out_specs=_VMEM_SPEC,
        )(x, y, w_top, w_bot, bias, w_fc_pad, b_fc_pad)
        return out[:, :OUTPUT_DIM]
    else:
        out_x, out_y = pl.pallas_call(
            _fused_mode1_kernel,
            out_shape=(jax.ShapeDtypeStruct((B, O_PAD), jnp.float32),
                       jax.ShapeDtypeStruct((B, O_PAD), jnp.float32)),
            in_specs=[_VMEM_SPEC] * 7,
            out_specs=(_VMEM_SPEC, _VMEM_SPEC),
        )(x, y, w_top, w_bot, bias, w_fc_pad, b_fc_pad)
        return out_x[:, :OUTPUT_DIM], out_y[:, :OUTPUT_DIM]


def make_raw_params(key):
    """Deterministic PyTorch-shaped parameters.

    nn.LSTM(input_dim, 512, 1): W_ih (4H, D), b_ih (4H,), b_hh (4H,)
      (W_hh never materialized: h0 == 0 for every forward call)
    nn.Linear(512, output_dim): W_fc (O, H), b_fc (O,)
    """
    k1, k2, k3, k4, k5 = jax.random.split(key, 5)
    s = 1.0 / jnp.sqrt(jnp.float32(HIDDEN))
    w_ih = jax.random.uniform(k1, (4 * HIDDEN, INPUT_DIM), jnp.float32, -s, s)
    b_ih = jax.random.uniform(k2, (4 * HIDDEN,), jnp.float32, -s, s)
    b_hh = jax.random.uniform(k3, (4 * HIDDEN,), jnp.float32, -s, s)
    w_fc = jax.random.uniform(k4, (OUTPUT_DIM, HIDDEN), jnp.float32, -s, s)
    b_fc = jax.random.uniform(k5, (OUTPUT_DIM,), jnp.float32, -s, s)
    return w_ih, b_ih, b_hh, w_fc, b_fc


def prepare_kernel_params(raw):
    """Prune the forget gate, split W_ih^T into x/y halves, cast to bf16, pad fc."""
    w_ih, b_ih, b_hh, w_fc, b_fc = raw
    H = HIDDEN
    # PyTorch gate order along rows of W_ih is [i | f | g | o]; drop the f block.
    keep = jnp.concatenate([jnp.arange(0, H), jnp.arange(2 * H, 4 * H)])
    w_igo_t = w_ih[keep].T                            # (D, 3H)
    w_top = w_igo_t[:D_HALF].astype(jnp.bfloat16)     # (D/2, 3H) — multiplies x
    w_bot = w_igo_t[D_HALF:].astype(jnp.bfloat16)     # (D/2, 3H) — multiplies y
    bias = (b_ih + b_hh)[keep].reshape(1, THREE_H).astype(jnp.float32)
    # Lane-dense fc: pad output columns 100 -> 128 with zeros.
    w_fc_pad = jnp.zeros((H, O_PAD), jnp.float32).at[:, :OUTPUT_DIM].set(w_fc.T)
    w_fc_pad = w_fc_pad.astype(jnp.bfloat16)
    b_fc_pad = jnp.zeros((1, O_PAD), jnp.float32).at[0, :OUTPUT_DIM].set(b_fc)
    return w_top, w_bot, bias, w_fc_pad, b_fc_pad


def _reference_forward(x, y, mode, raw):
    """Pure-JAX f32 reference with the full (un-pruned) PyTorch formulation."""
    w_ih, b_ih, b_hh, w_fc, b_fc = raw

    def step(fused):
        gates = fused @ w_ih.T + b_ih + b_hh
        i, f, g, o = jnp.split(gates, 4, axis=1)
        c = jax.nn.sigmoid(i) * jnp.tanh(g)          # f * c0 == 0
        h = jax.nn.sigmoid(o) * jnp.tanh(c)
        return h @ w_fc.T + b_fc

    if mode == 0:
        return step(jnp.concatenate((x, y), axis=1))
    feat_x = jnp.concatenate((x, jnp.zeros_like(y)), axis=1)
    feat_y = jnp.concatenate((jnp.zeros_like(x), y), axis=1)
    return step(feat_x), step(feat_y)


if __name__ == "__main__":
    key = jax.random.PRNGKey(0)
    kx, ky = jax.random.split(key)
    x = jax.random.normal(kx, (BATCH, D_HALF), jnp.float32)
    y = jax.random.normal(ky, (BATCH, D_HALF), jnp.float32)

    raw = make_raw_params(jax.random.PRNGKey(42))
    params = prepare_kernel_params(raw)

    # bf16 weights -> loosened tolerance vs. the f32 reference.
    ATOL = 2e-2
    RTOL = 2e-2

    # mode == 0
    out0 = jax.block_until_ready(lstm_fusion_forward(x, y, 0, params))
    ref0 = _reference_forward(x, y, 0, raw)
    assert out0.shape == (BATCH, OUTPUT_DIM)
    assert jnp.allclose(out0, ref0, atol=ATOL, rtol=RTOL)

    # mode != 0
    out_x, out_y = lstm_fusion_forward(x, y, 1, params)
    out_x = jax.block_until_ready(out_x)
    out_y = jax.block_until_ready(out_y)
    ref_x, ref_y = _reference_forward(x, y, 1, raw)
    assert out_x.shape == (BATCH, OUTPUT_DIM) and out_y.shape == (BATCH, OUTPUT_DIM)
    assert jnp.allclose(out_x, ref_x, atol=ATOL, rtol=RTOL)
    assert jnp.allclose(out_y, ref_y, atol=ATOL, rtol=RTOL)

    print("KERNEL_OK")
</pallas_src>

<mosaic_0001>
module attributes {stable_mosaic.version = 11 : i64} {
  func.func @_fused_mode0_kernel(%arg0: memref<2x128xf32, #tpu.memory_space<vmem>>, %arg1: memref<2x128xf32, #tpu.memory_space<vmem>>, %arg2: memref<128x1536xbf16, #tpu.memory_space<vmem>>, %arg3: memref<128x1536xbf16, #tpu.memory_space<vmem>>, %arg4: memref<1x1536xf32, #tpu.memory_space<vmem>>, %arg5: memref<512x128xbf16, #tpu.memory_space<vmem>>, %arg6: memref<1x128xf32, #tpu.memory_space<vmem>>, %arg7: memref<2x128xf32, #tpu.memory_space<vmem>>) attributes {dimension_semantics = [], scalar_prefetch = 0 : i64, scratch_operands = 0 : i64, tpu.core_type = #tpu.core_type<tc>} {
    %c0 = arith.constant 0 : index
    %c0_0 = arith.constant 0 : index
    %0 = vector.load %arg0[%c0, %c0_0] : memref<2x128xf32, #tpu.memory_space<vmem>>, vector<2x128xf32>
    %1 = arith.truncf %0 : vector<2x128xf32> to vector<2x128xbf16>
    %c0_1 = arith.constant 0 : index
    %c0_2 = arith.constant 0 : index
    %2 = vector.load %arg2[%c0_1, %c0_2] : memref<128x1536xbf16, #tpu.memory_space<vmem>>, vector<128x1536xbf16>
    %cst = arith.constant dense<0.000000e+00> : vector<2x1536xf32>
    %3 = tpu.matmul %1, %2, %cst {dimension_numbers = #tpu.dot_dimension_numbers<[1], [0], [0], [1], [0, 0, 1, 1], [], []>} : vector<2x128xbf16>, vector<128x1536xbf16>, vector<2x1536xf32> -> vector<2x1536xf32>
    %c0_3 = arith.constant 0 : index
    %c0_4 = arith.constant 0 : index
    %4 = vector.load %arg1[%c0_3, %c0_4] : memref<2x128xf32, #tpu.memory_space<vmem>>, vector<2x128xf32>
    %5 = arith.truncf %4 : vector<2x128xf32> to vector<2x128xbf16>
    %c0_5 = arith.constant 0 : index
    %c0_6 = arith.constant 0 : index
    %6 = vector.load %arg3[%c0_5, %c0_6] : memref<128x1536xbf16, #tpu.memory_space<vmem>>, vector<128x1536xbf16>
    %cst_7 = arith.constant dense<0.000000e+00> : vector<2x1536xf32>
    %7 = tpu.matmul %5, %6, %cst_7 {dimension_numbers = #tpu.dot_dimension_numbers<[1], [0], [0], [1], [0, 0, 1, 1], [], []>} : vector<2x128xbf16>, vector<128x1536xbf16>, vector<2x1536xf32> -> vector<2x1536xf32>
    %8 = arith.addf %3, %7 : vector<2x1536xf32>
    %c0_8 = arith.constant 0 : index
    %c0_9 = arith.constant 0 : index
    %9 = vector.load %arg4[%c0_8, %c0_9] : memref<1x1536xf32, #tpu.memory_space<vmem>>, vector<1x1536xf32>
    %10 = vector.broadcast %9 : vector<1x1536xf32> to vector<2x1536xf32>
    %11 = arith.addf %8, %10 : vector<2x1536xf32>
    %12 = vector.extract_strided_slice %11 {offsets = [0, 0], sizes = [2, 512], strides = [1, 1]} : vector<2x1536xf32> to vector<2x512xf32>
    %13 = arith.negf %12 : vector<2x512xf32>
    %14 = math.exp %13 : vector<2x512xf32>
    %cst_10 = arith.constant 1.000000e+00 : f32
    %15 = vector.broadcast %cst_10 : f32 to vector<2x512xf32>
    %16 = arith.addf %15, %14 : vector<2x512xf32>
    %17 = arith.divf %15, %16 : vector<2x512xf32>
    %18 = vector.extract_strided_slice %11 {offsets = [0, 512], sizes = [2, 512], strides = [1, 1]} : vector<2x1536xf32> to vector<2x512xf32>
    %19 = math.tanh %18 : vector<2x512xf32>
    %20 = vector.extract_strided_slice %11 {offsets = [0, 1024], sizes = [2, 512], strides = [1, 1]} : vector<2x1536xf32> to vector<2x512xf32>
    %21 = arith.negf %20 : vector<2x512xf32>
    %22 = math.exp %21 : vector<2x512xf32>
    %cst_11 = arith.constant 1.000000e+00 : f32
    %23 = vector.broadcast %cst_11 : f32 to vector<2x512xf32>
    %24 = arith.addf %23, %22 : vector<2x512xf32>
    %25 = arith.divf %23, %24 : vector<2x512xf32>
    %26 = arith.mulf %17, %19 : vector<2x512xf32>
    %27 = math.tanh %26 : vector<2x512xf32>
    %28 = arith.mulf %25, %27 : vector<2x512xf32>
    %29 = arith.truncf %28 : vector<2x512xf32> to vector<2x512xbf16>
    %c0_12 = arith.constant 0 : index
    %c0_13 = arith.constant 0 : index
    %30 = vector.load %arg5[%c0_12, %c0_13] : memref<512x128xbf16, #tpu.memory_space<vmem>>, vector<512x128xbf16>
    %cst_14 = arith.constant dense<0.000000e+00> : vector<2x128xf32>
    %31 = tpu.matmul %29, %30, %cst_14 {dimension_numbers = #tpu.dot_dimension_numbers<[1], [0], [0], [1], [0, 0, 1, 1], [], []>} : vector<2x512xbf16>, vector<512x128xbf16>, vector<2x128xf32> -> vector<2x128xf32>
    %c0_15 = arith.constant 0 : index
    %c0_16 = arith.constant 0 : index
    %32 = vector.load %arg6[%c0_15, %c0_16] : memref<1x128xf32, #tpu.memory_space<vmem>>, vector<1x128xf32>
    %33 = vector.broadcast %32 : vector<1x128xf32> to vector<2x128xf32>
    %34 = arith.addf %31, %33 : vector<2x128xf32>
    %c0_17 = arith.constant 0 : index
    %c0_18 = arith.constant 0 : index
    %35 = vector.load %arg7[%c0_17, %c0_18] : memref<2x128xf32, #tpu.memory_space<vmem>>, vector<2x128xf32>
    tpu.vector_store %arg7[%c0_17, %c0_18], %34 {strides = array<i32>} : memref<2x128xf32, #tpu.memory_space<vmem>>, vector<2x128xf32>,
    return
  }
}

</mosaic_0001>

<bundles_post_ra>
// kernel: tpu_custom_call.1
= control target key start
LH: loop header
LB: loop body
LE: loop exit
PB: predicated region body
PF: predicated region fallthrough
CT: control target
= control target key end

     0   :  { %12 = vsyncpa [#allocation3], 0  ;;  %s3784_s0 = inlined_call_operand.hbm [shape: f32[2,128], index: 0, kind: input, shape index: {}]   ;;  %s3785_s1 = inlined_call_operand.hbm [shape: f32[2,128], index: 1, kind: input, shape index: {}]   ;;  %s3786_s2 = inlined_call_operand.hbm [shape: bf16[128,1536], index: 2, kind: input, shape index: {}]   ;;  %s3787_s3 = inlined_call_operand.hbm [shape: bf16[128,1536], index: 3, kind: input, shape index: {}]   ;;  %s3788_s4 = inlined_call_operand.hbm [shape: f32[1,1536], index: 4, kind: input, shape index: {}]   ;;  %s3789_s5 = inlined_call_operand.hbm [shape: bf16[512,128], index: 5, kind: input, shape index: {}]   ;;  %s3790_s6 = inlined_call_operand.vmem [shape: f32[1,128], index: 6, kind: input, shape index: {}]   ;;  %s3791_s7 = inlined_call_operand.hbm [shape: f32[2,128], index: 7, kind: output, shape index: {}]  }
   0x1   :  { %13 = vsyncpa [#allocation6], 0 }
   0x2   :  { %14 = vsyncpa [#allocation9], 0 }
   0x3   :  { %15 = vsyncpa [#allocation12], 0  ;;  %s33_s26 = sshll.u32 %s3785_s1, 4  ;;  %s34_s26 = int_to_ptr.hbm [resolvable:$true] %s33_s26 }
   0x4   :  { %16 = vsyncpa [#allocation4], 0  ;;  %s3494_s27 = smov [#allocation5]   ;;  %s56_s8 = sshll.u32 %s3787_s3, 4  ;;  %s57_s8 = int_to_ptr.hbm [resolvable:$true] %s56_s8 }
   0x5   :  { %s35_s28 = sshll.u32 %s3494_s27, 4  ;;  %s3495_s9 = smov [#allocation8]   ;;  %s36_s28 = int_to_ptr.vmem [resolvable:$true] %s35_s28 }
   0x6   :  { %38 = dma.hbm_to_vmem [thread:$0]  %s34_s26, 32, %s36_s28, [#allocation6]  }
   0x7   :  { %s58_s10 = sshll.u32 %s3495_s9, 4  ;;  %s22_s13 = sshll.u32 %s3784_s0, 4  ;;  %s59_s10 = int_to_ptr.vmem [resolvable:$true] %s58_s10  ;;  %s23_s13 = int_to_ptr.hbm [resolvable:$true] %s22_s13 }
   0x8   :  { %s3496_s1 = smov 768   ;;  %s3497_s14 = smov 48  }
   0x9   :  { %64 = dma.hbm_to_vmem [thread:$0]  %s57_s8, 12288, %s59_s10, [#allocation9], %s3496_s1, %s3496_s1, %s3497_s14  }
   0xa   :  { %s43_s17 = sshll.u32 %s3786_s2, 4  ;;  %s3498_s18 = smov [#allocation2]   ;;  %s44_s17 = int_to_ptr.hbm [resolvable:$true] %s43_s17 }
   0xb   :  { %s24_s19 = sshll.u32 %s3498_s18, 4  ;;  %s3499_s3 = smov [#allocation7]   ;;  %s25_s19 = int_to_ptr.vmem [resolvable:$true] %s24_s19 }
   0xc   :  { %27 = dma.hbm_to_vmem [thread:$0]  %s23_s13, 32, %s25_s19, [#allocation3]  }
   0xd   :  { %s45_s20 = sshll.u32 %s3499_s3, 4  ;;  %s70_s0 = sshll.u32 %s3788_s4, 4  ;;  %s46_s20 = int_to_ptr.vmem [resolvable:$true] %s45_s20  ;;  %s71_s0 = int_to_ptr.hbm [resolvable:$true] %s70_s0 }
   0xe   :  { %51 = dma.hbm_to_vmem [thread:$0]  %s44_s17, 12288, %s46_s20, [#allocation6], %s3496_s1, %s3496_s1, %s3497_s14  }
   0xf   :  { %s80_s25 = sshll.u32 %s3789_s5, 4  ;;  %s3500_s26 = smov [#allocation10]   ;;  %s81_s25 = int_to_ptr.hbm [resolvable:$true] %s80_s25 }
  0x10   :  { %s72_s2 = sshll.u32 %s3500_s26, 4  ;;  %s3501_s27 = smov [#allocation11]   ;;  %s73_s2 = int_to_ptr.vmem [resolvable:$true] %s72_s2 }
  0x11   :  { %75 = dma.hbm_to_vmem [thread:$0]  %s71_s0, 192, %s73_s2, [#allocation9]  }
  0x12   :  { %s82_s28 = sshll.u32 %s3501_s27, 4  ;;  %s3502_s29 = smov 64   ;;  %s83_s28 = int_to_ptr.vmem [resolvable:$true] %s82_s28 }
  0x13   :  { %s3503_s30 = smov 4  }
  0x14   :  { %88 = dma.hbm_to_vmem [thread:$0]  %s81_s25, 4096, %s83_s28, [#allocation12], %s3502_s29, %s3502_s29, %s3503_s30  }
  0x15   :  { %3484 = dma.done.wait [#allocation3], 32  }
  0x16   :  { %3485 = vsyncadd [#allocation3], 4294967264 }
  0x17   :  { %3486 = dma.done.wait [#allocation6], 12320  }
  0x18   :  { %3487 = vsyncadd [#allocation6], 4294954976 }
  0x19   :  { %3488 = dma.done.wait [#allocation9], 12480  }
  0x1a   :  { %3489 = vsyncadd [#allocation9], 4294954816 }
  0x1b   :  { %3490 = dma.done.wait [#allocation12], 4096  }
  0x1c   :  { %3491 = vsyncadd [#allocation12], 4294963200  ;;  %v2466_v0 = vld [vmem:[#allocation8 + $0x2a0] sm:$0xf]  ;;  %v3218_v1 = vld [vmem:[#allocation8 + $0x2cc] sm:$0xf0] }
  0x1d   :  { %v3212_v2 = vld [vmem:[#allocation8 + $0x2a4] sm:$0xf]  ;;  %v2467_v3 = vor.u32 %v3218_v1, %v2466_v0  ;;  %v2468_v4 = vld [vmem:[#allocation8 + $0x2d0] sm:$0xf0]  ;;  %v2474_v5 = vld [vmem:[#allocation8 + $0x2a8] sm:$0xf] }
  0x1e   :  { %v3219_v6 = vld [vmem:[#allocation8 + $0x2d4] sm:$0xf0]  ;;  %v2471_v7 = vor.u32 %v3212_v2, %v2468_v4  ;;  %v3213_v9 = vld [vmem:[#allocation8 + $0x2ac] sm:$0xf]  ;;  %v2476_v10 = vld [vmem:[#allocation8 + $0x2d8] sm:$0xf0] }
  0x1f   :  { %v2475_v8 = vor.u32 %v3219_v6, %v2474_v5  ;;  %v2418_v11 = vld [vmem:[#allocation8 + $0x240] sm:$0xf]  ;;  %791 = vmatpush.bf16.msra.mxu0 %v2467_v3  ;;  %v2479_v12 = vor.u32 %v3213_v9, %v2476_v10  ;;  %v3206_v13 = vld [vmem:[#allocation8 + $0x26c] sm:$0xf0]  ;;  %v3200_v14 = vld [vmem:[#allocation8 + $0x244] sm:$0xf] }
  0x20   :  { %v2420_v15 = vld [vmem:[#allocation8 + $0x270] sm:$0xf0]  ;;  %804 = vmatpush.bf16.msra.mxu1 %v2471_v7  ;;  %v2419_v16 = vor.u32 %v3206_v13, %v2418_v11  ;;  %v2426_v18 = vld [vmem:[#allocation8 + $0x248] sm:$0xf]  ;;  %v3207_v19 = vld [vmem:[#allocation8 + $0x274] sm:$0xf0] }
  0x21   :  { %817 = vmatpush.bf16.msra.mxu2 %v2475_v8  ;;  %v2423_v17 = vor.u32 %v3200_v14, %v2420_v15  ;;  %v3201_v20 = vld [vmem:[#allocation8 + $0x24c] sm:$0xf]  ;;  %830 = vmatpush.bf16.msra.mxu3 %v2479_v12  ;;  %v2427_v21 = vor.u32 %v3207_v19, %v2426_v18  ;;  %v2428_v22 = vld [vmem:[#allocation8 + $0x278] sm:$0xf0]  ;;  %v2370_v23 = vld [vmem:[#allocation8 + $0x1e0] sm:$0xf] }
  0x22   :  { %v3194_v24 = vld [vmem:[#allocation8 + $0x20c] sm:$0xf0]  ;;  %v2431_v25 = vor.u32 %v3201_v20, %v2428_v22  ;;  %v3188_v26 = vld [vmem:[#allocation8 + $0x1e4] sm:$0xf]  ;;  %v2372_v27 = vld [vmem:[#allocation8 + $0x210] sm:$0xf0] }
  0x23   :  { %v2378_v28 = vld [vmem:[#allocation8 + $0x1e8] sm:$0xf]  ;;  %792 = vmatpush.bf16.msra.mxu0 %v2419_v16  ;;  %v2371_v29 = vor.u32 %v3194_v24, %v2370_v23  ;;  %v3195_v30 = vld [vmem:[#allocation8 + $0x214] sm:$0xf0]  ;;  %v3189_v31 = vld [vmem:[#allocation8 + $0x1ec] sm:$0xf]  ;;  %v2375_v33 = vor.u32 %v3188_v26, %v2372_v27 }
  0x24   :  { %v2380_v32 = vld [vmem:[#allocation8 + $0x218] sm:$0xf0]  ;;  %805 = vmatpush.bf16.msra.mxu1 %v2423_v17  ;;  %v2379_v34 = vor.u32 %v3195_v30, %v2378_v28  ;;  %v2322_v35 = vld [vmem:[#allocation8 + $0x180] sm:$0xf]  ;;  %v3182_v36 = vld [vmem:[#allocation8 + $0x1ac] sm:$0xf0] }
  0x25   :  { %818 = vmatpush.bf16.msra.mxu2 %v2427_v21  ;;  %v3176_v37 = vld [vmem:[#allocation8 + $0x184] sm:$0xf]  ;;  %831 = vmatpush.bf16.msra.mxu3 %v2431_v25  ;;  %v2383_v38 = vor.u32 %v3189_v31, %v2380_v32  ;;  %v2324_v39 = vld [vmem:[#allocation8 + $0x1b0] sm:$0xf0]  ;;  %v2330_v40 = vld [vmem:[#allocation8 + $0x188] sm:$0xf]  ;;  %v2323_v44 = vor.u32 %v3182_v36, %v2322_v35 }
  0x26   :  { %v3183_v41 = vld [vmem:[#allocation8 + $0x1b4] sm:$0xf0]  ;;  %v3177_v42 = vld [vmem:[#allocation8 + $0x18c] sm:$0xf]  ;;  %v2332_v43 = vld [vmem:[#allocation8 + $0x1b8] sm:$0xf0]  ;;  %v2327_v45 = vor.u32 %v3176_v37, %v2324_v39 }
  0x27   :  { %793 = vmatpush.bf16.msra.mxu0 %v2371_v29  ;;  %v2331_v46 = vor.u32 %v3183_v41, %v2330_v40  ;;  %v2274_v47 = vld [vmem:[#allocation8 + $0x120] sm:$0xf]  ;;  %v3170_v48 = vld [vmem:[#allocation8 + $0x14c] sm:$0xf0]  ;;  %v3164_v49 = vld [vmem:[#allocation8 + $0x124] sm:$0xf]  ;;  %v2335_v50 = vor.u32 %v3177_v42, %v2332_v43 }
  0x28   :  { %806 = vmatpush.bf16.msra.mxu1 %v2375_v33  ;;  %v2276_v51 = vld [vmem:[#allocation8 + $0x150] sm:$0xf0]  ;;  %v2282_v52 = vld [vmem:[#allocation8 + $0x128] sm:$0xf]  ;;  %v3171_v53 = vld [vmem:[#allocation8 + $0x154] sm:$0xf0]  ;;  %v2275_v56 = vor.u32 %v3170_v48, %v2274_v47 }
  0x29   :  { %819 = vmatpush.bf16.msra.mxu2 %v2379_v34  ;;  %832 = vmatpush.bf16.msra.mxu3 %v2383_v38  ;;  %v3165_v54 = vld [vmem:[#allocation8 + $0x12c] sm:$0xf]  ;;  %v2284_v55 = vld [vmem:[#allocation8 + $0x158] sm:$0xf0]  ;;  %v2279_v57 = vor.u32 %v3164_v49, %v2276_v51  ;;  %v2283_v58 = vor.u32 %v3171_v53, %v2282_v52  ;;  %v2226_v59 = vld [vmem:[#allocation8 + $0xc0] sm:$0xf] }
  0x2a   :  { %v3158_v60 = vld [vmem:[#allocation8 + $0xec] sm:$0xf0]  ;;  %v3152_v61 = vld [vmem:[#allocation8 + $0xc4] sm:$0xf]  ;;  %v2287_v62 = vor.u32 %v3165_v54, %v2284_v55  ;;  %v2228_v63 = vld [vmem:[#allocation8 + $0xf0] sm:$0xf0] }
  0x2b   :  { %794 = vmatpush.bf16.msra.mxu0 %v2323_v44  ;;  %v2234_v0 = vld [vmem:[#allocation8 + $0xc8] sm:$0xf]  ;;  %v3159_v1 = vld [vmem:[#allocation8 + $0xf4] sm:$0xf0]  ;;  %v3153_v2 = vld [vmem:[#allocation8 + $0xcc] sm:$0xf]  ;;  %v2227_v4 = vor.u32 %v3158_v60, %v2226_v59  ;;  %v2231_v5 = vor.u32 %v3152_v61, %v2228_v63 }
  0x2c   :  { %807 = vmatpush.bf16.msra.mxu1 %v2327_v45  ;;  %v2236_v3 = vld [vmem:[#allocation8 + $0xf8] sm:$0xf0]  ;;  %v2235_v6 = vor.u32 %v3159_v1, %v2234_v0  ;;  %v2178_v7 = vld [vmem:[#allocation8 + $0x60] sm:$0xf]  ;;  %v3146_v8 = vld [vmem:[#allocation8 + $0x8c] sm:$0xf0] }
  0x2d   :  { %820 = vmatpush.bf16.msra.mxu2 %v2331_v46  ;;  %833 = vmatpush.bf16.msra.mxu3 %v2335_v50  ;;  %v3140_v9 = vld [vmem:[#allocation8 + $0x64] sm:$0xf]  ;;  %v2239_v10 = vor.u32 %v3153_v2, %v2236_v3  ;;  %v2180_v11 = vld [vmem:[#allocation8 + $0x90] sm:$0xf0]  ;;  %v2186_v12 = vld [vmem:[#allocation8 + $0x68] sm:$0xf]  ;;  %v2179_v16 = vor.u32 %v3146_v8, %v2178_v7 }
  0x2e   :  { %v3147_v13 = vld [vmem:[#allocation8 + $0x94] sm:$0xf0]  ;;  %v3141_v14 = vld [vmem:[#allocation8 + $0x6c] sm:$0xf]  ;;  %v2188_v15 = vld [vmem:[#allocation8 + $0x98] sm:$0xf0]  ;;  %v2183_v19 = vor.u32 %v3140_v9, %v2180_v11 }
  0x2f   :  { %795 = vmatpush.bf16.msra.mxu0 %v2275_v56  ;;  %v2130_v17 = vld [vmem:[#allocation8] sm:$0xf]  ;;  %v3134_v18 = vld [vmem:[#allocation8 + $0x2c] sm:$0xf0]  ;;  %v2187_v20 = vor.u32 %v3147_v13, %v2186_v12  ;;  %v3128_v21 = vld [vmem:[#allocation8 + $0x4] sm:$0xf]  ;;  %v2191_v24 = vor.u32 %v3141_v14, %v2188_v15 }
  0x30   :  { %808 = vmatpush.bf16.msra.mxu1 %v2279_v57  ;;  %v2132_v22 = vld [vmem:[#allocation8 + $0x30] sm:$0xf0]  ;;  %v2138_v23 = vld [vmem:[#allocation8 + $0x8] sm:$0xf]  ;;  %v3135_v25 = vld [vmem:[#allocation8 + $0x34] sm:$0xf0]  ;;  %v2131_v31 = vor.u32 %v3134_v18, %v2130_v17 }
  0x31   :  { %821 = vmatpush.bf16.msra.mxu2 %v2283_v58  ;;  %834 = vmatpush.bf16.msra.mxu3 %v2287_v62  ;;  %v3129_v26 = vld [vmem:[#allocation8 + $0xc] sm:$0xf]  ;;  %v2140_v27 = vld [vmem:[#allocation8 + $0x38] sm:$0xf0]  ;;  %v2482_v28 = vld [vmem:[#allocation8 + $0x2b0] sm:$0xf]  ;;  %v2135_v35 = vor.u32 %v3128_v21, %v2132_v22  ;;  %v2139_v36 = vor.u32 %v3135_v25, %v2138_v23 }
  0x32   :  { %v3220_v29 = vld [vmem:[#allocation8 + $0x2dc] sm:$0xf0]  ;;  %v3214_v30 = vld [vmem:[#allocation8 + $0x2b4] sm:$0xf]  ;;  %v2484_v32 = vld [vmem:[#allocation8 + $0x2e0] sm:$0xf0]  ;;  %v2143_v39 = vor.u32 %v3129_v26, %v2140_v27 }
  0x33   :  { %796 = vmatpush.bf16.msra.mxu0 %v2227_v4  ;;  %v2490_v33 = vld [vmem:[#allocation8 + $0x2b8] sm:$0xf]  ;;  %v3221_v34 = vld [vmem:[#allocation8 + $0x2e4] sm:$0xf0]  ;;  %v3215_v37 = vld [vmem:[#allocation8 + $0x2bc] sm:$0xf]  ;;  %v2483_v40 = vor.u32 %v3220_v29, %v2482_v28  ;;  %v2487_v41 = vor.u32 %v3214_v30, %v2484_v32 }
  0x34   :  { %809 = vmatpush.bf16.msra.mxu1 %v2231_v5  ;;  %v2492_v38 = vld [vmem:[#allocation8 + $0x2e8] sm:$0xf0]  ;;  %v2491_v42 = vor.u32 %v3221_v34, %v2490_v33  ;;  %v2434_v43 = vld [vmem:[#allocation8 + $0x250] sm:$0xf]  ;;  %v3208_v44 = vld [vmem:[#allocation8 + $0x27c] sm:$0xf0] }
  0x35   :  { %822 = vmatpush.bf16.msra.mxu2 %v2235_v6  ;;  %835 = vmatpush.bf16.msra.mxu3 %v2239_v10  ;;  %v3202_v45 = vld [vmem:[#allocation8 + $0x254] sm:$0xf]  ;;  %v2495_v46 = vor.u32 %v3215_v37, %v2492_v38  ;;  %v2436_v47 = vld [vmem:[#allocation8 + $0x280] sm:$0xf0]  ;;  %v2442_v48 = vld [vmem:[#allocation8 + $0x258] sm:$0xf]  ;;  %v2435_v52 = vor.u32 %v3208_v44, %v2434_v43 }
  0x36   :  { %v3209_v49 = vld [vmem:[#allocation8 + $0x284] sm:$0xf0]  ;;  %v3203_v50 = vld [vmem:[#allocation8 + $0x25c] sm:$0xf]  ;;  %v2444_v51 = vld [vmem:[#allocation8 + $0x288] sm:$0xf0]  ;;  %v2439_v53 = vor.u32 %v3202_v45, %v2436_v47 }
  0x37   :  { %797 = vmatpush.bf16.msra.mxu0 %v2179_v16  ;;  %v2443_v54 = vor.u32 %v3209_v49, %v2442_v48  ;;  %v2386_v55 = vld [vmem:[#allocation8 + $0x1f0] sm:$0xf]  ;;  %v3196_v56 = vld [vmem:[#allocation8 + $0x21c] sm:$0xf0]  ;;  %v3190_v57 = vld [vmem:[#allocation8 + $0x1f4] sm:$0xf]  ;;  %v2447_v58 = vor.u32 %v3203_v50, %v2444_v51 }
  0x38   :  { %810 = vmatpush.bf16.msra.mxu1 %v2183_v19  ;;  %v2388_v59 = vld [vmem:[#allocation8 + $0x220] sm:$0xf0]  ;;  %v2394_v60 = vld [vmem:[#allocation8 + $0x1f8] sm:$0xf]  ;;  %v3197_v61 = vld [vmem:[#allocation8 + $0x224] sm:$0xf0]  ;;  %v2387_v0 = vor.u32 %v3196_v56, %v2386_v55 }
  0x39   :  { %823 = vmatpush.bf16.msra.mxu2 %v2187_v20  ;;  %836 = vmatpush.bf16.msra.mxu3 %v2191_v24  ;;  %v3191_v62 = vld [vmem:[#allocation8 + $0x1fc] sm:$0xf]  ;;  %v2396_v63 = vld [vmem:[#allocation8 + $0x228] sm:$0xf0]  ;;  %v2391_v2 = vor.u32 %v3190_v57, %v2388_v59  ;;  %v2395_v3 = vor.u32 %v3197_v61, %v2394_v60  ;;  %v2338_v4 = vld [vmem:[#allocation8 + $0x190] sm:$0xf] }
  0x3a   :  { %v213_v1 = vld [vmem:[#allocation5] sm:$0x3]  ;;  %v3184_v5 = vld [vmem:[#allocation8 + $0x1bc] sm:$0xf0]  ;;  %v3178_v6 = vld [vmem:[#allocation8 + $0x194] sm:$0xf]  ;;  %v2399_v8 = vor.u32 %v3191_v62, %v2396_v63 }
  0x3b   :  { %798 = vmatpush.bf16.msra.mxu0 %v2131_v31  ;;  %v3563_v7 = vpack.c.bf16 %v213_v1, %v213_v1  ;;  %v2340_v9 = vld [vmem:[#allocation8 + $0x1c0] sm:$0xf0]  ;;  %v2346_v10 = vld [vmem:[#allocation8 + $0x198] sm:$0xf]  ;;  %v3185_v11 = vld [vmem:[#allocation8 + $0x1c4] sm:$0xf0]  ;;  %v2339_v14 = vor.u32 %v3184_v5, %v2338_v4 }
  0x3c   :  { %811 = vmatpush.bf16.msra.mxu1 %v2135_v35  ;;  %v3179_v12 = vld [vmem:[#allocation8 + $0x19c] sm:$0xf]  ;;  %v2348_v13 = vld [vmem:[#allocation8 + $0x1c8] sm:$0xf0]  ;;  %v2343_v15 = vor.u32 %v3178_v6, %v2340_v9  ;;  %v2347_v16 = vor.u32 %v3185_v11, %v2346_v10  ;;  %v2290_v17 = vld [vmem:[#allocation8 + $0x130] sm:$0xf] }
  0x3d   :  { %824 = vmatpush.bf16.msra.mxu2 %v2139_v36  ;;  %837 = vmatpush.bf16.msra.mxu3 %v2143_v39  ;;  %v3172_v18 = vld [vmem:[#allocation8 + $0x15c] sm:$0xf0]  ;;  %v3166_v19 = vld [vmem:[#allocation8 + $0x134] sm:$0xf]  ;;  %v2351_v20 = vor.u32 %v3179_v12, %v2348_v13  ;;  %v2292_v21 = vld [vmem:[#allocation8 + $0x160] sm:$0xf0] }
  0x3e   :  { %v2298_v22 = vld [vmem:[#allocation8 + $0x138] sm:$0xf]  ;;  %v3173_v23 = vld [vmem:[#allocation8 + $0x164] sm:$0xf0]  ;;  %799 = vmatmul.bf16.vlgmr.msra.gmra.mxu0 %v3563_v7  ;;  %v3167_v24 = vld [vmem:[#allocation8 + $0x13c] sm:$0xf]  ;;  %v2291_v26 = vor.u32 %v3172_v18, %v2290_v17  ;;  %v2295_v27 = vor.u32 %v3166_v19, %v2292_v21 }
  0x3f   :  { %843 = vmatpush.bf16.msrb.mxu0 %v2483_v40  ;;  %812 = vmatmul.bf16.vlgmr.msra.gmra.mxu1 %v3563_v7  ;;  %v2300_v25 = vld [vmem:[#allocation8 + $0x168] sm:$0xf0]  ;;  %v2299_v28 = vor.u32 %v3173_v23, %v2298_v22  ;;  %v2242_v29 = vld [vmem:[#allocation8 + $0xd0] sm:$0xf]  ;;  %v3160_v30 = vld [vmem:[#allocation8 + $0xfc] sm:$0xf0] }
  0x40   :  { %856 = vmatpush.bf16.msrb.mxu1 %v2487_v41  ;;  %825 = vmatmul.bf16.vlgmr.msra.gmra.mxu2 %v3563_v7  ;;  %v3154_v31 = vld [vmem:[#allocation8 + $0xd4] sm:$0xf]  ;;  %v2303_v32 = vor.u32 %v3167_v24, %v2300_v25  ;;  %v2244_v33 = vld [vmem:[#allocation8 + $0x100] sm:$0xf0]  ;;  %v2250_v34 = vld [vmem:[#allocation8 + $0xd8] sm:$0xf]  ;;  %v2243_v38 = vor.u32 %v3160_v30, %v2242_v29 }
  0x41   :  { %869 = vmatpush.bf16.msrb.mxu2 %v2491_v42  ;;  %882 = vmatpush.bf16.msrb.mxu3 %v2495_v46  ;;  %v3161_v35 = vld [vmem:[#allocation8 + $0x104] sm:$0xf0]  ;;  %v3155_v36 = vld [vmem:[#allocation8 + $0xdc] sm:$0xf]  ;;  %v2252_v37 = vld [vmem:[#allocation8 + $0x108] sm:$0xf0]  ;;  %v2247_v39 = vor.u32 %v3154_v31, %v2244_v33 }
  0x42   :  { %838 = vmatmul.bf16.vlgmr.msra.gmra.mxu3 %v3563_v7  ;;  %v2251_v40 = vor.u32 %v3161_v35, %v2250_v34  ;;  %v2194_v41 = vld [vmem:[#allocation8 + $0x70] sm:$0xf]  ;;  %v3148_v42 = vld [vmem:[#allocation8 + $0x9c] sm:$0xf0]  ;;  %v3142_v43 = vld [vmem:[#allocation8 + $0x74] sm:$0xf]  ;;  %v2255_v44 = vor.u32 %v3155_v36, %v2252_v37 }
  0x43   :  { %844 = vmatpush.bf16.msrb.mxu0 %v2435_v52  ;;  %v2196_v45 = vld [vmem:[#allocation8 + $0xa0] sm:$0xf0]  ;;  %v2202_v46 = vld [vmem:[#allocation8 + $0x78] sm:$0xf]  ;;  %v3149_v47 = vld [vmem:[#allocation8 + $0xa4] sm:$0xf0]  ;;  %v2195_v50 = vor.u32 %v3148_v42, %v2194_v41 }
  0x44   :  { %857 = vmatpush.bf16.msrb.mxu1 %v2439_v53  ;;  %v3143_v48 = vld [vmem:[#allocation8 + $0x7c] sm:$0xf]  ;;  %v2204_v49 = vld [vmem:[#allocation8 + $0xa8] sm:$0xf0]  ;;  %v2146_v51 = vld [vmem:[#allocation8 + $0x10] sm:$0xf]  ;;  %v2199_v53 = vor.u32 %v3142_v43, %v2196_v45 }
  0x45   :  { %870 = vmatpush.bf16.msrb.mxu2 %v2443_v54  ;;  %883 = vmatpush.bf16.msrb.mxu3 %v2447_v58  ;;  %v3136_v52 = vld [vmem:[#allocation8 + $0x3c] sm:$0xf0]  ;;  %v2203_v54 = vor.u32 %v3149_v47, %v2202_v46  ;;  %v3130_v55 = vld [vmem:[#allocation8 + $0x14] sm:$0xf]  ;;  %v2148_v56 = vld [vmem:[#allocation8 + $0x40] sm:$0xf0]  ;;  %v2207_v58 = vor.u32 %v3143_v48, %v2204_v49 }
  0x46   :  { %v2154_v57 = vld [vmem:[#allocation8 + $0x18] sm:$0xf]  ;;  %v3137_v59 = vld [vmem:[#allocation8 + $0x44] sm:$0xf0]  ;;  %v3131_v60 = vld [vmem:[#allocation8 + $0x1c] sm:$0xf]  ;;  %v2147_v1 = vor.u32 %v3136_v52, %v2146_v51  ;;  %v2151_v5 = vor.u32 %v3130_v55, %v2148_v56 }
  0x47   :  { %845 = vmatpush.bf16.msrb.mxu0 %v2387_v0  ;;  %v2156_v61 = vld [vmem:[#allocation8 + $0x48] sm:$0xf0]  ;;  %v2498_v62 = vld [vmem:[#allocation8 + $0x2c0] sm:$0xf]  ;;  %v3222_v63 = vld [vmem:[#allocation8 + $0x2ec] sm:$0xf0]  ;;  %v2155_v6 = vor.u32 %v3137_v59, %v2154_v57 }
  0x48   :  { %858 = vmatpush.bf16.msrb.mxu1 %v2391_v2  ;;  %v3216_v0 = vld [vmem:[#allocation8 + $0x2c4] sm:$0xf]  ;;  %v2500_v2 = vld [vmem:[#allocation8 + $0x2f0] sm:$0xf0]  ;;  %v3223_v4 = vld [vmem:[#allocation8 + $0x2f4] sm:$0xf0]  ;;  %v2159_v10 = vor.u32 %v3131_v60, %v2156_v61  ;;  %v2499_v11 = vor.u32 %v3222_v63, %v2498_v62 }
  0x49   :  { %871 = vmatpush.bf16.msrb.mxu2 %v2395_v3  ;;  %884 = vmatpush.bf16.msrb.mxu3 %v2399_v8  ;;  %v2506_v3 = vld [vmem:[#allocation8 + $0x2c8] sm:$0xf]  ;;  %v3217_v8 = vld [vmem:[#allocation8 + $0x2cc] sm:$0xf]  ;;  %v2508_v9 = vld [vmem:[#allocation8 + $0x2f8] sm:$0xf0]  ;;  %v2503_v12 = vor.u32 %v3216_v0, %v2500_v2 }
  0x4a   :  { %v2507_v13 = vor.u32 %v3223_v4, %v2506_v3  ;;  %v2511_v17 = vor.u32 %v3217_v8, %v2508_v9  ;;  %v2452_v18 = vld [vmem:[#allocation8 + $0x290] sm:$0xf0]  ;;  %v2458_v19 = vld [vmem:[#allocation8 + $0x268] sm:$0xf]  ;;  %v3205_v21 = vld [vmem:[#allocation8 + $0x26c] sm:$0xf] }
  0x4b   :  { %846 = vmatpush.bf16.msrb.mxu0 %v2339_v14  ;;  %v2450_v14 = vld [vmem:[#allocation8 + $0x260] sm:$0xf]  ;;  %v2460_v22 = vld [vmem:[#allocation8 + $0x298] sm:$0xf0]  ;;  %v2404_v30 = vld [vmem:[#allocation8 + $0x230] sm:$0xf0] }
  0x4c   :  { %859 = vmatpush.bf16.msrb.mxu1 %v2343_v15  ;;  %v3210_v15 = vld [vmem:[#allocation8 + $0x28c] sm:$0xf0]  ;;  %v2463_v29 = vor.u32 %v3205_v21, %v2460_v22  ;;  %v2410_v31 = vld [vmem:[#allocation8 + $0x208] sm:$0xf]  ;;  %v3193_v33 = vld [vmem:[#allocation8 + $0x20c] sm:$0xf] }
  0x4d   :  { %872 = vmatpush.bf16.msrb.mxu2 %v2347_v16  ;;  %885 = vmatpush.bf16.msrb.mxu3 %v2351_v20  ;;  %v3204_v16 = vld [vmem:[#allocation8 + $0x264] sm:$0xf]  ;;  %v3211_v20 = vld [vmem:[#allocation8 + $0x294] sm:$0xf0]  ;;  %v2451_v23 = vor.u32 %v3210_v15, %v2450_v14  ;;  %v2412_v34 = vld [vmem:[#allocation8 + $0x238] sm:$0xf0] }
  0x4e   :  { %v2455_v24 = vor.u32 %v3204_v16, %v2452_v18  ;;  %v2459_v25 = vor.u32 %v3211_v20, %v2458_v19  ;;  %v2415_v41 = vor.u32 %v3193_v33, %v2412_v34  ;;  %v2356_v42 = vld [vmem:[#allocation8 + $0x1d0] sm:$0xf0]  ;;  %v2362_v43 = vld [vmem:[#allocation8 + $0x1a8] sm:$0xf]  ;;  %v3181_v45 = vld [vmem:[#allocation8 + $0x1ac] sm:$0xf] }
  0x4f   :  { %847 = vmatpush.bf16.msrb.mxu0 %v2291_v26  ;;  %v2402_v26 = vld [vmem:[#allocation8 + $0x200] sm:$0xf]  ;;  %v2364_v46 = vld [vmem:[#allocation8 + $0x1d8] sm:$0xf0]  ;;  %v3174_v51 = vld [vmem:[#allocation8 + $0x16c] sm:$0xf0] }
  0x50   :  { %860 = vmatpush.bf16.msrb.mxu1 %v2295_v27  ;;  %v3198_v27 = vld [vmem:[#allocation8 + $0x22c] sm:$0xf0]  ;;  %v3168_v52 = vld [vmem:[#allocation8 + $0x144] sm:$0xf]  ;;  %v2314_v55 = vld [vmem:[#allocation8 + $0x148] sm:$0xf] }
  0x51   :  { %873 = vmatpush.bf16.msrb.mxu2 %v2299_v28  ;;  %886 = vmatpush.bf16.msrb.mxu3 %v2303_v32  ;;  %v3192_v28 = vld [vmem:[#allocation8 + $0x204] sm:$0xf]  ;;  %v3199_v32 = vld [vmem:[#allocation8 + $0x234] sm:$0xf0]  ;;  %v2403_v35 = vor.u32 %v3198_v27, %v2402_v26  ;;  %v3169_v57 = vld [vmem:[#allocation8 + $0x14c] sm:$0xf] }
  0x52   :  { %v2407_v36 = vor.u32 %v3192_v28, %v2404_v30  ;;  %v2411_v37 = vor.u32 %v3199_v32, %v2410_v31  ;;  %v3175_v56 = vld [vmem:[#allocation8 + $0x174] sm:$0xf0]  ;;  %v2258_v62 = vld [vmem:[#allocation8 + $0xe0] sm:$0xf]  ;;  %v3162_v63 = vld [vmem:[#allocation8 + $0x10c] sm:$0xf0] }
  0x53   :  { %848 = vmatpush.bf16.msrb.mxu0 %v2243_v38  ;;  %v2354_v38 = vld [vmem:[#allocation8 + $0x1a0] sm:$0xf]  ;;  %v2315_v61 = vor.u32 %v3175_v56, %v2314_v55  ;;  %v3156_v0 = vld [vmem:[#allocation8 + $0xe4] sm:$0xf]  ;;  %v2260_v2 = vld [vmem:[#allocation8 + $0x110] sm:$0xf0]  ;;  %v2259_v8 = vor.u32 %v3162_v63, %v2258_v62 }
  0x54   :  { %861 = vmatpush.bf16.msrb.mxu1 %v2247_v39  ;;  %v3186_v39 = vld [vmem:[#allocation8 + $0x1cc] sm:$0xf0]  ;;  %v2266_v3 = vld [vmem:[#allocation8 + $0xe8] sm:$0xf]  ;;  %v3163_v4 = vld [vmem:[#allocation8 + $0x114] sm:$0xf0]  ;;  %v2263_v9 = vor.u32 %v3156_v0, %v2260_v2 }
  0x55   :  { %874 = vmatpush.bf16.msrb.mxu2 %v2251_v40  ;;  %887 = vmatpush.bf16.msrb.mxu3 %v2255_v44  ;;  %v3180_v40 = vld [vmem:[#allocation8 + $0x1a4] sm:$0xf]  ;;  %v3187_v44 = vld [vmem:[#allocation8 + $0x1d4] sm:$0xf0]  ;;  %v2355_v47 = vor.u32 %v3186_v39, %v2354_v38  ;;  %v2212_v15 = vld [vmem:[#allocation8 + $0xb0] sm:$0xf0] }
  0x56   :  { %v2359_v48 = vor.u32 %v3180_v40, %v2356_v42  ;;  %v2363_v49 = vor.u32 %v3187_v44, %v2362_v43  ;;  %v2218_v16 = vld [vmem:[#allocation8 + $0x88] sm:$0xf]  ;;  %v3145_v18 = vld [vmem:[#allocation8 + $0x8c] sm:$0xf]  ;;  %v2220_v19 = vld [vmem:[#allocation8 + $0xb8] sm:$0xf0] }
  0x57   :  { %849 = vmatpush.bf16.msrb.mxu0 %v2195_v50  ;;  %v2306_v50 = vld [vmem:[#allocation8 + $0x140] sm:$0xf]  ;;  %v3138_v22 = vld [vmem:[#allocation8 + $0x4c] sm:$0xf0]  ;;  %v2164_v26 = vld [vmem:[#allocation8 + $0x50] sm:$0xf0]  ;;  %v2223_v28 = vor.u32 %v3145_v18, %v2220_v19 }
  0x58   :  { %862 = vmatpush.bf16.msrb.mxu1 %v2199_v53  ;;  %v2367_v53 = vor.u32 %v3181_v45, %v2364_v46  ;;  %v2307_v59 = vor.u32 %v3174_v51, %v2306_v50  ;;  %v2162_v21 = vld [vmem:[#allocation8 + $0x20] sm:$0xf]  ;;  %v2170_v27 = vld [vmem:[#allocation8 + $0x28] sm:$0xf]  ;;  %v3133_v30 = vld [vmem:[#allocation8 + $0x2c] sm:$0xf] }
  0x59   :  { %875 = vmatpush.bf16.msrb.mxu2 %v2203_v54  ;;  %888 = vmatpush.bf16.msrb.mxu3 %v2207_v58  ;;  %v2308_v54 = vld [vmem:[#allocation8 + $0x170] sm:$0xf0]  ;;  %v2316_v58 = vld [vmem:[#allocation8 + $0x178] sm:$0xf0]  ;;  %v2850_v32 = vld [vmem:[#allocation7 + $0x2a0] sm:$0xf] }
  0x5a   :  { %v2311_v60 = vor.u32 %v3168_v52, %v2308_v54  ;;  %v2172_v31 = vld [vmem:[#allocation8 + $0x58] sm:$0xf0]  ;;  %v3122_v33 = vld [vmem:[#allocation7 + $0x2cc] sm:$0xf0]  ;;  %v3116_v34 = vld [vmem:[#allocation7 + $0x2a4] sm:$0xf] }
  0x5b   :  { %850 = vmatpush.bf16.msrb.mxu0 %v2147_v1  ;;  %v2319_v1 = vor.u32 %v3169_v57, %v2316_v58  ;;  %v3123_v38 = vld [vmem:[#allocation7 + $0x2d4] sm:$0xf0]  ;;  %v2860_v42 = vld [vmem:[#allocation7 + $0x2d8] sm:$0xf0]  ;;  %v2175_v43 = vor.u32 %v3133_v30, %v2172_v31  ;;  %v2851_v44 = vor.u32 %v3122_v33, %v2850_v32  ;;  %v2804_v51 = vld [vmem:[#allocation7 + $0x270] sm:$0xf0] }
  0x5c   :  { %863 = vmatpush.bf16.msrb.mxu1 %v2151_v5  ;;  %v3157_v5 = vld [vmem:[#allocation8 + $0xec] sm:$0xf]  ;;  %v2810_v52 = vld [vmem:[#allocation7 + $0x248] sm:$0xf]  ;;  %v2812_v55 = vld [vmem:[#allocation7 + $0x278] sm:$0xf0] }
  0x5d   :  { %876 = vmatpush.bf16.msrb.mxu2 %v2155_v6  ;;  %889 = vmatpush.bf16.msrb.mxu3 %v2159_v10  ;;  %v2268_v6 = vld [vmem:[#allocation8 + $0x118] sm:$0xf0]  ;;  %v2267_v10 = vor.u32 %v3163_v4, %v2266_v3  ;;  %v3105_v54 = vld [vmem:[#allocation7 + $0x24c] sm:$0xf]  ;;  %v2756_v63 = vld [vmem:[#allocation7 + $0x210] sm:$0xf0] }
  0x5e   :  { %851 = vmatmul.bf16.vlgmr.msrb.gmra.mxu0 %v3563_v7  ;;  %v2271_v14 = vor.u32 %v3157_v5, %v2268_v6  ;;  %v2815_v62 = vor.u32 %v3105_v54, %v2812_v55  ;;  %v2762_v0 = vld [vmem:[#allocation7 + $0x1e8] sm:$0xf]  ;;  %v3093_v2 = vld [vmem:[#allocation7 + $0x1ec] sm:$0xf]  ;;  %v2764_v3 = vld [vmem:[#allocation7 + $0x218] sm:$0xf0] }
  0x5f   :  { %895 = vmatpush.bf16.msra.mxu0 %v2499_v11  ;;  %864 = vmatmul.bf16.vlgmr.msrb.gmra.mxu1 %v3563_v7  ;;  %v2210_v11 = vld [vmem:[#allocation8 + $0x80] sm:$0xf]  ;;  %v3062_v32 = vld [vmem:[#allocation7 + $0xec] sm:$0xf0]  ;;  %v3056_v33 = vld [vmem:[#allocation7 + $0xc4] sm:$0xf] }
  0x60   :  { %908 = vmatpush.bf16.msra.mxu1 %v2503_v12  ;;  %877 = vmatmul.bf16.vlgmr.msrb.gmra.mxu2 %v3563_v7  ;;  %v3150_v12 = vld [vmem:[#allocation8 + $0xac] sm:$0xf0]  ;;  %v2658_v19 = vld [vmem:[#allocation7 + $0x120] sm:$0xf]  ;;  %s3504_s8 = smov [#allocation13]   ;;  %s2115_s12 = sshll.u32 %s3791_s7, 4  ;;  %s2116_s12 = int_to_ptr.hbm [resolvable:$true] %s2115_s12 }
  0x61   :  { %921 = vmatpush.bf16.msra.mxu2 %v2507_v13  ;;  %934 = vmatpush.bf16.msra.mxu3 %v2511_v17  ;;  %v3144_v13 = vld [vmem:[#allocation8 + $0x84] sm:$0xf]  ;;  %v3151_v17 = vld [vmem:[#allocation8 + $0xb4] sm:$0xf0]  ;;  %v2211_v20 = vor.u32 %v3150_v12, %v2210_v11  ;;  %v2767_v11 = vor.u32 %v3093_v2, %v2764_v3  ;;  %v2708_v12 = vld [vmem:[#allocation7 + $0x1b0] sm:$0xf0] }
  0x62   :  { %890 = vmatmul.bf16.vlgmr.msrb.gmra.mxu3 %v3563_v7  ;;  %v2610_v31 = vld [vmem:[#allocation7 + $0xc0] sm:$0xf]  ;;  %v3038_v54 = vld [vmem:[#allocation7 + $0x2c] sm:$0xf0]  ;;  %v3118_v2 = vld [vmem:[#allocation7 + $0x2b4] sm:$0xf] }
  0x63   :  { %896 = vmatpush.bf16.msra.mxu0 %v2451_v23  ;;  %v2215_v23 = vor.u32 %v3144_v13, %v2212_v15  ;;  %v2714_v13 = vld [vmem:[#allocation7 + $0x188] sm:$0xf]  ;;  %v3081_v15 = vld [vmem:[#allocation7 + $0x18c] sm:$0xf]  ;;  %s2113_s9 = sshll.u32 %s3504_s8, 4  ;;  %s2114_s9 = int_to_ptr.vmem [resolvable:$true] %s2113_s9 }
  0x64   :  { %909 = vmatpush.bf16.msra.mxu1 %v2455_v24  ;;  %v2219_v24 = vor.u32 %v3151_v17, %v2218_v16  ;;  %v2716_v16 = vld [vmem:[#allocation7 + $0x1b8] sm:$0xf0] }
  0x65   :  { %922 = vmatpush.bf16.msra.mxu2 %v2459_v25  ;;  %935 = vmatpush.bf16.msra.mxu3 %v2463_v29  ;;  %v3132_v25 = vld [vmem:[#allocation8 + $0x24] sm:$0xf]  ;;  %v3139_v29 = vld [vmem:[#allocation8 + $0x54] sm:$0xf0] }
  0x66   :  { %v2167_v39 = vor.u32 %v3132_v25, %v2164_v26  ;;  %v2171_v40 = vor.u32 %v3139_v29, %v2170_v27  ;;  %v3075_v25 = vld [vmem:[#allocation7 + $0x154] sm:$0xf0]  ;;  %v3069_v26 = vld [vmem:[#allocation7 + $0x12c] sm:$0xf]  ;;  %v2668_v27 = vld [vmem:[#allocation7 + $0x158] sm:$0xf0] }
  0x67   :  { %897 = vmatpush.bf16.msra.mxu0 %v2403_v35  ;;  %v2163_v35 = vor.u32 %v3138_v22, %v2162_v21  ;;  %v3068_v21 = vld [vmem:[#allocation7 + $0x124] sm:$0xf]  ;;  %v2719_v22 = vor.u32 %v3081_v15, %v2716_v16 }
  0x68   :  { %910 = vmatpush.bf16.msra.mxu1 %v2407_v36  ;;  %v2852_v36 = vld [vmem:[#allocation7 + $0x2d0] sm:$0xf0] }
  0x69   :  { %923 = vmatpush.bf16.msra.mxu2 %v2411_v37  ;;  %936 = vmatpush.bf16.msra.mxu3 %v2415_v41  ;;  %v2858_v37 = vld [vmem:[#allocation7 + $0x2a8] sm:$0xf]  ;;  %v3117_v41 = vld [vmem:[#allocation7 + $0x2ac] sm:$0xf]  ;;  %v2855_v45 = vor.u32 %v3116_v34, %v2852_v36  ;;  %v2671_v34 = vor.u32 %v3069_v26, %v2668_v27 }
  0x6a   :  { %v2859_v46 = vor.u32 %v3123_v38, %v2858_v37  ;;  %v2863_v50 = vor.u32 %v3117_v41, %v2860_v42  ;;  %v2618_v36 = vld [vmem:[#allocation7 + $0xc8] sm:$0xf]  ;;  %v3063_v37 = vld [vmem:[#allocation7 + $0xf4] sm:$0xf0]  ;;  %v3057_v38 = vld [vmem:[#allocation7 + $0xcc] sm:$0xf] }
  0x6b   :  { %898 = vmatpush.bf16.msra.mxu0 %v2355_v47  ;;  %v2802_v47 = vld [vmem:[#allocation7 + $0x240] sm:$0xf]  ;;  %v2619_v42 = vor.u32 %v3063_v37, %v2618_v36  ;;  %v3095_v36 = vld [vmem:[#allocation7 + $0x1fc] sm:$0xf]  ;;  %v2780_v37 = vld [vmem:[#allocation7 + $0x228] sm:$0xf0] }
  0x6c   :  { %911 = vmatpush.bf16.msra.mxu1 %v2359_v48  ;;  %v3110_v48 = vld [vmem:[#allocation7 + $0x26c] sm:$0xf0] }
  0x6d   :  { %924 = vmatpush.bf16.msra.mxu2 %v2363_v49  ;;  %937 = vmatpush.bf16.msra.mxu3 %v2367_v53  ;;  %v3104_v49 = vld [vmem:[#allocation7 + $0x244] sm:$0xf]  ;;  %v3111_v53 = vld [vmem:[#allocation7 + $0x274] sm:$0xf0]  ;;  %v2803_v56 = vor.u32 %v3110_v48, %v2802_v47  ;;  %v2564_v47 = vld [vmem:[#allocation7 + $0x90] sm:$0xf0] }
  0x6e   :  { %v2807_v57 = vor.u32 %v3104_v49, %v2804_v51  ;;  %v2811_v58 = vor.u32 %v3111_v53, %v2810_v52  ;;  %v2570_v48 = vld [vmem:[#allocation7 + $0x68] sm:$0xf]  ;;  %v3051_v49 = vld [vmem:[#allocation7 + $0x94] sm:$0xf0]  ;;  %v2572_v51 = vld [vmem:[#allocation7 + $0x98] sm:$0xf0] }
  0x6f   :  { %899 = vmatpush.bf16.msra.mxu0 %v2307_v59  ;;  %v2754_v59 = vld [vmem:[#allocation7 + $0x1e0] sm:$0xf] }
  0x70   :  { %912 = vmatpush.bf16.msra.mxu1 %v2311_v60  ;;  %v3098_v60 = vld [vmem:[#allocation7 + $0x20c] sm:$0xf0]  ;;  %v2514_v53 = vld [vmem:[#allocation7] sm:$0xf] }
  0x71   :  { %925 = vmatpush.bf16.msra.mxu2 %v2315_v61  ;;  %938 = vmatpush.bf16.msra.mxu3 %v2319_v1  ;;  %v3092_v61 = vld [vmem:[#allocation7 + $0x1e4] sm:$0xf]  ;;  %v3099_v1 = vld [vmem:[#allocation7 + $0x214] sm:$0xf0]  ;;  %v2755_v4 = vor.u32 %v3098_v60, %v2754_v59  ;;  %v2522_v59 = vld [vmem:[#allocation7 + $0x8] sm:$0xf]  ;;  %v2515_v3 = vor.u32 %v3038_v54, %v2514_v53 }
  0x72   :  { %v2759_v5 = vor.u32 %v3092_v61, %v2756_v63  ;;  %v2763_v6 = vor.u32 %v3099_v1, %v2762_v0  ;;  %v3039_v61 = vld [vmem:[#allocation7 + $0x34] sm:$0xf0]  ;;  %v2524_v63 = vld [vmem:[#allocation7 + $0x38] sm:$0xf0]  ;;  %v2866_v0 = vld [vmem:[#allocation7 + $0x2b0] sm:$0xf] }
  0x73   :  { %900 = vmatpush.bf16.msra.mxu0 %v2259_v8  ;;  %v2706_v8 = vld [vmem:[#allocation7 + $0x180] sm:$0xf]  ;;  %v2674_v53 = vld [vmem:[#allocation7 + $0x130] sm:$0xf] }
  0x74   :  { %913 = vmatpush.bf16.msra.mxu1 %v2263_v9  ;;  %v3086_v9 = vld [vmem:[#allocation7 + $0x1ac] sm:$0xf0]  ;;  %v3124_v1 = vld [vmem:[#allocation7 + $0x2dc] sm:$0xf0] }
  0x75   :  { %926 = vmatpush.bf16.msra.mxu2 %v2267_v10  ;;  %939 = vmatpush.bf16.msra.mxu3 %v2271_v14  ;;  %v3080_v10 = vld [vmem:[#allocation7 + $0x184] sm:$0xf]  ;;  %v3087_v14 = vld [vmem:[#allocation7 + $0x1b4] sm:$0xf0]  ;;  %v2707_v17 = vor.u32 %v3086_v9, %v2706_v8  ;;  %v2523_v9 = vor.u32 %v3039_v61, %v2522_v59  ;;  %v3076_v54 = vld [vmem:[#allocation7 + $0x15c] sm:$0xf0] }
  0x76   :  { %v2711_v18 = vor.u32 %v3080_v10, %v2708_v12  ;;  %v3119_v10 = vld [vmem:[#allocation7 + $0x2bc] sm:$0xf]  ;;  %v3077_v59 = vld [vmem:[#allocation7 + $0x164] sm:$0xf0]  ;;  %v2684_v61 = vld [vmem:[#allocation7 + $0x168] sm:$0xf0] }
  0x77   :  { %901 = vmatpush.bf16.msra.mxu0 %v2211_v20  ;;  %v3074_v20 = vld [vmem:[#allocation7 + $0x14c] sm:$0xf0]  ;;  %v115_v12 = vld [vmem:[#allocation2] sm:$0x3] }
  0x78   :  { %914 = vmatpush.bf16.msra.mxu1 %v2215_v23  ;;  %v2660_v23 = vld [vmem:[#allocation7 + $0x150] sm:$0xf0] }
  0x79   :  { %927 = vmatpush.bf16.msra.mxu2 %v2219_v24  ;;  %940 = vmatpush.bf16.msra.mxu3 %v2223_v28  ;;  %v2666_v24 = vld [vmem:[#allocation7 + $0x128] sm:$0xf]  ;;  %v2659_v28 = vor.u32 %v3074_v20, %v2658_v19  ;;  %v2663_v29 = vor.u32 %v3068_v21, %v2660_v23  ;;  %v3577_v20 = vpack.c.bf16 %v115_v12, %v115_v12  ;;  %v2820_v21 = vld [vmem:[#allocation7 + $0x280] sm:$0xf0] }
  0x7a   :  { %v2667_v30 = vor.u32 %v3075_v25, %v2666_v24  ;;  %v3113_v23 = vld [vmem:[#allocation7 + $0x284] sm:$0xf0]  ;;  %v3107_v24 = vld [vmem:[#allocation7 + $0x25c] sm:$0xf]  ;;  %v2828_v25 = vld [vmem:[#allocation7 + $0x288] sm:$0xf0] }
  0x7b   :  { %902 = vmatpush.bf16.msra.mxu0 %v2163_v35  ;;  %v2612_v35 = vld [vmem:[#allocation7 + $0xf0] sm:$0xf0] }
  0x7c   :  { %915 = vmatpush.bf16.msra.mxu1 %v2167_v39  ;;  %v2620_v39 = vld [vmem:[#allocation7 + $0xf8] sm:$0xf0]  ;;  %v2615_v41 = vor.u32 %v3056_v33, %v2612_v35  ;;  %v2772_v33 = vld [vmem:[#allocation7 + $0x220] sm:$0xf0]  ;;  %v3101_v35 = vld [vmem:[#allocation7 + $0x224] sm:$0xf0] }
  0x7d   :  { %928 = vmatpush.bf16.msra.mxu2 %v2171_v40  ;;  %941 = vmatpush.bf16.msra.mxu3 %v2175_v43  ;;  %v2611_v40 = vor.u32 %v3062_v32, %v2610_v31  ;;  %v2562_v43 = vld [vmem:[#allocation7 + $0x60] sm:$0xf]  ;;  %v3094_v31 = vld [vmem:[#allocation7 + $0x1f4] sm:$0xf]  ;;  %v2831_v32 = vor.u32 %v3107_v24, %v2828_v25  ;;  %v2530_v24 = vld [vmem:[#allocation7 + $0x10] sm:$0xf] }
  0x7e   :  { %903 = vmatmul.bf16.vlgmr.msra.gmra.mxu0 %v3563_v7  ;;  %v3040_v25 = vld [vmem:[#allocation7 + $0x3c] sm:$0xf0] }
  0x7f   :  { %1427 = vmatpush.bf16.msrb.mxu0 %v2851_v44  ;;  %916 = vmatmul.bf16.vlgmr.msra.gmra.mxu1 %v3563_v7  ;;  %v3050_v44 = vld [vmem:[#allocation7 + $0x8c] sm:$0xf0] }
  0x80   :  { %1440 = vmatpush.bf16.msrb.mxu1 %v2855_v45  ;;  %929 = vmatmul.bf16.vlgmr.msra.gmra.mxu2 %v3563_v7  ;;  %v3044_v45 = vld [vmem:[#allocation7 + $0x64] sm:$0xf]  ;;  %v2563_v52 = vor.u32 %v3050_v44, %v2562_v43  ;;  %v3082_v43 = vld [vmem:[#allocation7 + $0x194] sm:$0xf]  ;;  %v2783_v44 = vor.u32 %v3095_v36, %v2780_v37  ;;  %v3126_v36 = vld [vmem:[#allocation7 + $0x2ec] sm:$0xf0] }
  0x81   :  { %1453 = vmatpush.bf16.msrb.mxu2 %v2859_v46  ;;  %1466 = vmatpush.bf16.msrb.mxu3 %v2863_v50  ;;  %v2623_v46 = vor.u32 %v3057_v38, %v2620_v39  ;;  %v3045_v50 = vld [vmem:[#allocation7 + $0x6c] sm:$0xf]  ;;  %v2567_v55 = vor.u32 %v3044_v45, %v2564_v47  ;;  %v2775_v39 = vor.u32 %v3094_v31, %v2772_v33  ;;  %v2724_v45 = vld [vmem:[#allocation7 + $0x1c0] sm:$0xf0]  ;;  %v3089_v47 = vld [vmem:[#allocation7 + $0x1c4] sm:$0xf0] }
  0x82   :  { %942 = vmatmul.bf16.vlgmr.msra.gmra.mxu3 %v3563_v7  ;;  %v2715_v7 = vor.u32 %v3087_v14, %v2714_v13  ;;  %v2575_v60 = vor.u32 %v3045_v50, %v2572_v51  ;;  %v2867_v14 = vor.u32 %v3124_v1, %v2866_v0  ;;  %v2727_v51 = vor.u32 %v3082_v43, %v2724_v45  ;;  %v2626_v1 = vld [vmem:[#allocation7 + $0xd0] sm:$0xf]  ;;  %v3035_v33 = vld [vmem:[#allocation7 + $0x1c] sm:$0xf]  ;;  %v3120_v37 = vld [vmem:[#allocation7 + $0x2c4] sm:$0xf] }
  0x83   :  { %1428 = vmatpush.bf16.msrb.mxu0 %v2803_v56  ;;  %v2571_v56 = vor.u32 %v3051_v49, %v2570_v48  ;;  %v3083_v48 = vld [vmem:[#allocation7 + $0x19c] sm:$0xf]  ;;  %v2732_v49 = vld [vmem:[#allocation7 + $0x1c8] sm:$0xf0] }
  0x84   :  { %1441 = vmatpush.bf16.msrb.mxu1 %v2807_v57  ;;  %v3032_v57 = vld [vmem:[#allocation7 + $0x4] sm:$0xf]  ;;  %v2892_v45 = vld [vmem:[#allocation7 + $0x2f8] sm:$0xf0] }
  0x85   :  { %1454 = vmatpush.bf16.msrb.mxu2 %v2811_v58  ;;  %1467 = vmatpush.bf16.msrb.mxu3 %v2815_v62  ;;  %v2516_v58 = vld [vmem:[#allocation7 + $0x30] sm:$0xf0]  ;;  %v3033_v62 = vld [vmem:[#allocation7 + $0xc] sm:$0xf] }
  0x86   :  { %v2519_v8 = vor.u32 %v3032_v57, %v2516_v58  ;;  %v2527_v13 = vor.u32 %v3033_v62, %v2524_v63  ;;  %v2676_v57 = vld [vmem:[#allocation7 + $0x160] sm:$0xf0]  ;;  %v2682_v58 = vld [vmem:[#allocation7 + $0x138] sm:$0xf]  ;;  %v2675_v62 = vor.u32 %v3076_v54, %v2674_v53  ;;  %v2836_v54 = vld [vmem:[#allocation7 + $0x290] sm:$0xf0] }
  0x87   :  { %1429 = vmatpush.bf16.msrb.mxu0 %v2755_v4  ;;  %v2868_v4 = vld [vmem:[#allocation7 + $0x2e0] sm:$0xf0]  ;;  %v2683_v0 = vor.u32 %v3077_v59, %v2682_v58  ;;  %v2844_v58 = vld [vmem:[#allocation7 + $0x298] sm:$0xf0] }
  0x88   :  { %1442 = vmatpush.bf16.msrb.mxu1 %v2759_v5  ;;  %v2874_v5 = vld [vmem:[#allocation7 + $0x2b8] sm:$0xf]  ;;  %v2871_v15 = vor.u32 %v3118_v2, %v2868_v4  ;;  %v3064_v2 = vld [vmem:[#allocation7 + $0xfc] sm:$0xf0] }
  0x89   :  { %1455 = vmatpush.bf16.msrb.mxu2 %v2763_v6  ;;  %1468 = vmatpush.bf16.msrb.mxu3 %v2767_v11  ;;  %v3125_v6 = vld [vmem:[#allocation7 + $0x2e4] sm:$0xf0]  ;;  %v2876_v11 = vld [vmem:[#allocation7 + $0x2e8] sm:$0xf0] }
  0x8a   :  { %v2875_v16 = vor.u32 %v3125_v6, %v2874_v5  ;;  %v2879_v19 = vor.u32 %v3119_v10, %v2876_v11  ;;  %v2628_v5 = vld [vmem:[#allocation7 + $0x100] sm:$0xf0]  ;;  %v2634_v6 = vld [vmem:[#allocation7 + $0xd8] sm:$0xf]  ;;  %v2636_v10 = vld [vmem:[#allocation7 + $0x108] sm:$0xf0]  ;;  %v2627_v11 = vor.u32 %v3064_v2, %v2626_v1 }
  0x8b   :  { %1430 = vmatpush.bf16.msrb.mxu0 %v2707_v17  ;;  %v2818_v17 = vld [vmem:[#allocation7 + $0x250] sm:$0xf]  ;;  %v2788_v2 = vld [vmem:[#allocation7 + $0x230] sm:$0xf0] }
  0x8c   :  { %1443 = vmatpush.bf16.msrb.mxu1 %v2711_v18  ;;  %v3112_v18 = vld [vmem:[#allocation7 + $0x27c] sm:$0xf0] }
  0x8d   :  { %1456 = vmatpush.bf16.msrb.mxu2 %v2715_v7  ;;  %1469 = vmatpush.bf16.msrb.mxu3 %v2719_v22  ;;  %v3106_v7 = vld [vmem:[#allocation7 + $0x254] sm:$0xf]  ;;  %v2826_v22 = vld [vmem:[#allocation7 + $0x258] sm:$0xf]  ;;  %v2819_v26 = vor.u32 %v3112_v18, %v2818_v17  ;;  %v2580_v18 = vld [vmem:[#allocation7 + $0xa0] sm:$0xf0] }
  0x8e   :  { %v2823_v27 = vor.u32 %v3106_v7, %v2820_v21  ;;  %v2586_v7 = vld [vmem:[#allocation7 + $0x78] sm:$0xf]  ;;  %v3047_v21 = vld [vmem:[#allocation7 + $0x7c] sm:$0xf] }
  0x8f   :  { %1431 = vmatpush.bf16.msrb.mxu0 %v2659_v28  ;;  %v2827_v28 = vor.u32 %v3113_v23, %v2826_v22  ;;  %v2588_v22 = vld [vmem:[#allocation7 + $0xa8] sm:$0xf0] }
  0x90   :  { %1444 = vmatpush.bf16.msrb.mxu1 %v2663_v29  ;;  %v2770_v29 = vld [vmem:[#allocation7 + $0x1f0] sm:$0xf]  ;;  %v2591_v31 = vor.u32 %v3047_v21, %v2588_v22 }
  0x91   :  { %1457 = vmatpush.bf16.msrb.mxu2 %v2667_v30  ;;  %1470 = vmatpush.bf16.msrb.mxu3 %v2671_v34  ;;  %v3100_v30 = vld [vmem:[#allocation7 + $0x21c] sm:$0xf0]  ;;  %v2778_v34 = vld [vmem:[#allocation7 + $0x1f8] sm:$0xf] }
  0x92   :  { %v2771_v38 = vor.u32 %v3100_v30, %v2770_v29  ;;  %v2532_v29 = vld [vmem:[#allocation7 + $0x40] sm:$0xf0]  ;;  %v2538_v30 = vld [vmem:[#allocation7 + $0x18] sm:$0xf] }
  0x93   :  { %1432 = vmatpush.bf16.msrb.mxu0 %v2611_v40  ;;  %v2779_v40 = vor.u32 %v3101_v35, %v2778_v34  ;;  %v2540_v34 = vld [vmem:[#allocation7 + $0x48] sm:$0xf0]  ;;  %v2882_v35 = vld [vmem:[#allocation7 + $0x2c0] sm:$0xf] }
  0x94   :  { %1445 = vmatpush.bf16.msrb.mxu1 %v2615_v41  ;;  %v2722_v41 = vld [vmem:[#allocation7 + $0x190] sm:$0xf] }
  0x95   :  { %1458 = vmatpush.bf16.msrb.mxu2 %v2619_v42  ;;  %1471 = vmatpush.bf16.msrb.mxu3 %v2623_v46  ;;  %v3088_v42 = vld [vmem:[#allocation7 + $0x1bc] sm:$0xf0]  ;;  %v2730_v46 = vld [vmem:[#allocation7 + $0x198] sm:$0xf] }
  0x96   :  { %v2723_v50 = vor.u32 %v3088_v42, %v2722_v41  ;;  %v3127_v41 = vld [vmem:[#allocation7 + $0x2f4] sm:$0xf0] }
  0x97   :  { %1433 = vmatpush.bf16.msrb.mxu0 %v2563_v52  ;;  %v2731_v52 = vor.u32 %v3089_v47, %v2730_v46  ;;  %v2543_v46 = vor.u32 %v3035_v33, %v2540_v34  ;;  %v2883_v47 = vor.u32 %v3126_v36, %v2882_v35  ;;  %v2642_v35 = vld [vmem:[#allocation7 + $0xe0] sm:$0xf]  ;;  %v3066_v36 = vld [vmem:[#allocation7 + $0x10c] sm:$0xf0] }
  0x98   :  { %1446 = vmatpush.bf16.msrb.mxu1 %v2567_v55  ;;  %v3070_v55 = vld [vmem:[#allocation7 + $0x134] sm:$0xf] }
  0x99   :  { %1459 = vmatpush.bf16.msrb.mxu2 %v2571_v56  ;;  %1472 = vmatpush.bf16.msrb.mxu3 %v2575_v60  ;;  %v2735_v56 = vor.u32 %v3083_v48, %v2732_v49  ;;  %v3071_v60 = vld [vmem:[#allocation7 + $0x13c] sm:$0xf]  ;;  %v2679_v63 = vor.u32 %v3070_v55, %v2676_v57  ;;  %v2842_v55 = vld [vmem:[#allocation7 + $0x268] sm:$0xf]  ;;  %v3109_v57 = vld [vmem:[#allocation7 + $0x26c] sm:$0xf] }
  0x9a   :  { %v2687_v4 = vor.u32 %v3071_v60, %v2684_v61  ;;  %v2847_v1 = vor.u32 %v3109_v57, %v2844_v58  ;;  %v3049_v58 = vld [vmem:[#allocation7 + $0x8c] sm:$0xf] }
  0x9b   :  { %1434 = vmatpush.bf16.msrb.mxu0 %v2515_v3  ;;  %v3058_v3 = vld [vmem:[#allocation7 + $0xd4] sm:$0xf] }
  0x9c   :  { %1447 = vmatpush.bf16.msrb.mxu1 %v2519_v8  ;;  %v3065_v8 = vld [vmem:[#allocation7 + $0x104] sm:$0xf0]  ;;  %v2631_v12 = vor.u32 %v3058_v3, %v2628_v5  ;;  %v3097_v5 = vld [vmem:[#allocation7 + $0x20c] sm:$0xf] }
  0x9d   :  { %1460 = vmatpush.bf16.msrb.mxu2 %v2523_v9  ;;  %1473 = vmatpush.bf16.msrb.mxu3 %v2527_v13  ;;  %v3059_v9 = vld [vmem:[#allocation7 + $0xdc] sm:$0xf]  ;;  %v2635_v13 = vor.u32 %v3065_v8, %v2634_v6  ;;  %v2794_v3 = vld [vmem:[#allocation7 + $0x208] sm:$0xf] }
  0x9e   :  { %1435 = vmatmul.bf16.vlgmr.msrb.gmra.mxu0 %v3577_v20  ;;  %v2639_v17 = vor.u32 %v3059_v9, %v2636_v10  ;;  %v2796_v6 = vld [vmem:[#allocation7 + $0x238] sm:$0xf0] }
  0x9f   :  { %1479 = vmatpush.bf16.msra.mxu0 %v2867_v14  ;;  %1448 = vmatmul.bf16.vlgmr.msrb.gmra.mxu1 %v3577_v20  ;;  %v2578_v14 = vld [vmem:[#allocation7 + $0x70] sm:$0xf] }
  0xa0   :  { %1492 = vmatpush.bf16.msra.mxu1 %v2871_v15  ;;  %1461 = vmatmul.bf16.vlgmr.msrb.gmra.mxu2 %v3577_v20  ;;  %v3052_v15 = vld [vmem:[#allocation7 + $0x9c] sm:$0xf0] }
  0xa1   :  { %1505 = vmatpush.bf16.msra.mxu2 %v2875_v16  ;;  %1518 = vmatpush.bf16.msra.mxu3 %v2879_v19  ;;  %v3046_v16 = vld [vmem:[#allocation7 + $0x74] sm:$0xf]  ;;  %v3053_v19 = vld [vmem:[#allocation7 + $0xa4] sm:$0xf0]  ;;  %v2579_v23 = vor.u32 %v3052_v15, %v2578_v14  ;;  %v2799_v14 = vor.u32 %v3097_v5, %v2796_v6  ;;  %v3043_v6 = vld [vmem:[#allocation7 + $0x54] sm:$0xf0] }
  0xa2   :  { %1474 = vmatmul.bf16.vlgmr.msrb.gmra.mxu3 %v3577_v20  ;;  %v2740_v15 = vld [vmem:[#allocation7 + $0x1d0] sm:$0xf0]  ;;  %v2554_v5 = vld [vmem:[#allocation7 + $0x28] sm:$0xf] }
  0xa3   :  { %1480 = vmatpush.bf16.msra.mxu0 %v2819_v26  ;;  %v2583_v26 = vor.u32 %v3046_v16, %v2580_v18  ;;  %v2746_v16 = vld [vmem:[#allocation7 + $0x1a8] sm:$0xf]  ;;  %v3085_v18 = vld [vmem:[#allocation7 + $0x1ac] sm:$0xf] }
  0xa4   :  { %1493 = vmatpush.bf16.msra.mxu1 %v2823_v27  ;;  %v2587_v27 = vor.u32 %v3053_v19, %v2586_v7  ;;  %v2748_v7 = vld [vmem:[#allocation7 + $0x1d8] sm:$0xf0] }
  0xa5   :  { %1506 = vmatpush.bf16.msra.mxu2 %v2827_v28  ;;  %1519 = vmatpush.bf16.msra.mxu3 %v2831_v32  ;;  %v3034_v28 = vld [vmem:[#allocation7 + $0x14] sm:$0xf]  ;;  %v3041_v32 = vld [vmem:[#allocation7 + $0x44] sm:$0xf0] }
  0xa6   :  { %v2535_v42 = vor.u32 %v3034_v28, %v2532_v29  ;;  %v2539_v43 = vor.u32 %v3041_v32, %v2538_v30  ;;  %v2698_v28 = vld [vmem:[#allocation7 + $0x148] sm:$0xf]  ;;  %v3079_v29 = vld [vmem:[#allocation7 + $0x174] sm:$0xf0]  ;;  %v3073_v30 = vld [vmem:[#allocation7 + $0x14c] sm:$0xf] }
  0xa7   :  { %1481 = vmatpush.bf16.msra.mxu0 %v2771_v38  ;;  %v2531_v38 = vor.u32 %v3040_v25, %v2530_v24  ;;  %v3078_v24 = vld [vmem:[#allocation7 + $0x16c] sm:$0xf0]  ;;  %v3072_v25 = vld [vmem:[#allocation7 + $0x144] sm:$0xf]  ;;  %v2699_v34 = vor.u32 %v3079_v29, %v2698_v28 }
  0xa8   :  { %1494 = vmatpush.bf16.msra.mxu1 %v2775_v39  ;;  %v2884_v39 = vld [vmem:[#allocation7 + $0x2f0] sm:$0xf0] }
  0xa9   :  { %1507 = vmatpush.bf16.msra.mxu2 %v2779_v40  ;;  %1520 = vmatpush.bf16.msra.mxu3 %v2783_v44  ;;  %v2890_v40 = vld [vmem:[#allocation7 + $0x2c8] sm:$0xf]  ;;  %v3121_v44 = vld [vmem:[#allocation7 + $0x2cc] sm:$0xf]  ;;  %v2887_v48 = vor.u32 %v3120_v37, %v2884_v39  ;;  %v3060_v37 = vld [vmem:[#allocation7 + $0xe4] sm:$0xf] }
  0xaa   :  { %v2891_v49 = vor.u32 %v3127_v41, %v2890_v40  ;;  %v2895_v53 = vor.u32 %v3121_v44, %v2892_v45  ;;  %v2644_v40 = vld [vmem:[#allocation7 + $0x110] sm:$0xf0]  ;;  %v2650_v41 = vld [vmem:[#allocation7 + $0xe8] sm:$0xf]  ;;  %v2652_v44 = vld [vmem:[#allocation7 + $0x118] sm:$0xf0] }
  0xab   :  { %1482 = vmatpush.bf16.msra.mxu0 %v2723_v50  ;;  %v2834_v50 = vld [vmem:[#allocation7 + $0x260] sm:$0xf] }
  0xac   :  { %1495 = vmatpush.bf16.msra.mxu1 %v2727_v51  ;;  %v3114_v51 = vld [vmem:[#allocation7 + $0x28c] sm:$0xf0] }
  0xad   :  { %1508 = vmatpush.bf16.msra.mxu2 %v2731_v52  ;;  %1521 = vmatpush.bf16.msra.mxu3 %v2735_v56  ;;  %v3108_v52 = vld [vmem:[#allocation7 + $0x264] sm:$0xf]  ;;  %v3115_v56 = vld [vmem:[#allocation7 + $0x294] sm:$0xf0]  ;;  %v2835_v59 = vor.u32 %v3114_v51, %v2834_v50  ;;  %v3054_v50 = vld [vmem:[#allocation7 + $0xac] sm:$0xf0] }
  0xae   :  { %v2839_v60 = vor.u32 %v3108_v52, %v2836_v54  ;;  %v2843_v61 = vor.u32 %v3115_v56, %v2842_v55  ;;  %v3048_v51 = vld [vmem:[#allocation7 + $0x84] sm:$0xf]  ;;  %v2602_v54 = vld [vmem:[#allocation7 + $0x88] sm:$0xf]  ;;  %v3055_v55 = vld [vmem:[#allocation7 + $0xb4] sm:$0xf0] }
  0xaf   :  { %1483 = vmatpush.bf16.msra.mxu0 %v2675_v62  ;;  %v2786_v62 = vld [vmem:[#allocation7 + $0x200] sm:$0xf] }
  0xb0   :  { %1496 = vmatpush.bf16.msra.mxu1 %v2679_v63  ;;  %v3102_v63 = vld [vmem:[#allocation7 + $0x22c] sm:$0xf0] }
  0xb1   :  { %1509 = vmatpush.bf16.msra.mxu2 %v2683_v0  ;;  %1522 = vmatpush.bf16.msra.mxu3 %v2687_v4  ;;  %v3096_v0 = vld [vmem:[#allocation7 + $0x204] sm:$0xf]  ;;  %v3103_v4 = vld [vmem:[#allocation7 + $0x234] sm:$0xf0]  ;;  %v2787_v8 = vor.u32 %v3102_v63, %v2786_v62  ;;  %v2603_v62 = vor.u32 %v3055_v55, %v2602_v54  ;;  %v2546_v63 = vld [vmem:[#allocation7 + $0x20] sm:$0xf] }
  0xb2   :  { %v2791_v9 = vor.u32 %v3096_v0, %v2788_v2  ;;  %v2795_v10 = vor.u32 %v3103_v4, %v2794_v3  ;;  %v3042_v0 = vld [vmem:[#allocation7 + $0x4c] sm:$0xf0]  ;;  %v2548_v4 = vld [vmem:[#allocation7 + $0x50] sm:$0xf0] }
  0xb3   :  { %1484 = vmatpush.bf16.msra.mxu0 %v2627_v11  ;;  %v2738_v11 = vld [vmem:[#allocation7 + $0x1a0] sm:$0xf] }
  0xb4   :  { %1497 = vmatpush.bf16.msra.mxu1 %v2631_v12  ;;  %v3090_v12 = vld [vmem:[#allocation7 + $0x1cc] sm:$0xf0] }
  0xb5   :  { %1510 = vmatpush.bf16.msra.mxu2 %v2635_v13  ;;  %1523 = vmatpush.bf16.msra.mxu3 %v2639_v17  ;;  %v3084_v13 = vld [vmem:[#allocation7 + $0x1a4] sm:$0xf]  ;;  %v3091_v17 = vld [vmem:[#allocation7 + $0x1d4] sm:$0xf0]  ;;  %v2739_v19 = vor.u32 %v3090_v12, %v2738_v11  ;;  %v2547_v11 = vor.u32 %v3042_v0, %v2546_v63  ;;  %v3230_v0 = vld [vmem:[#allocation11 + $0x30] sm:$0xff] }
  0xb6   :  { %v2743_v21 = vor.u32 %v3084_v13, %v2740_v15  ;;  %v2747_v22 = vor.u32 %v3091_v17, %v2746_v16  ;;  %v2555_v13 = vor.u32 %v3043_v6, %v2554_v5  ;;  %v3229_v5 = vld [vmem:[#allocation11 + $0x28] sm:$0xff] }
  0xb7   :  { %1485 = vmatpush.bf16.msra.mxu0 %v2579_v23  ;;  %v2690_v23 = vld [vmem:[#allocation7 + $0x140] sm:$0xf]  ;;  %v3237_v6 = vld [vmem:[#allocation11 + $0x68] sm:$0xff] }
  0xb8   :  { %1498 = vmatpush.bf16.msra.mxu1 %v2583_v26  ;;  %v2751_v26 = vor.u32 %v3085_v18, %v2748_v7  ;;  %v2691_v32 = vor.u32 %v3078_v24, %v2690_v23 }
  0xb9   :  { %1511 = vmatpush.bf16.msra.mxu2 %v2587_v27  ;;  %1524 = vmatpush.bf16.msra.mxu3 %v2591_v31  ;;  %v2692_v27 = vld [vmem:[#allocation7 + $0x170] sm:$0xf0]  ;;  %v2700_v31 = vld [vmem:[#allocation7 + $0x178] sm:$0xf0] }
  0xba   :  { %v2695_v33 = vor.u32 %v3072_v25, %v2692_v27  ;;  %v2703_v39 = vor.u32 %v3073_v30, %v2700_v31 }
  0xbb   :  { %1486 = vmatpush.bf16.msra.mxu0 %v2531_v38  ;;  %v3589_v45 = vpop.f32.mrf.mxu0 }
  0xbc   :  { %1499 = vmatpush.bf16.msra.mxu1 %v2535_v42  ;;  %v3587_v38 = vpop.f32.mrf.mxu1  ;;  %v3067_v42 = vld [vmem:[#allocation7 + $0x114] sm:$0xf0] }
  0xbd   :  { %1512 = vmatpush.bf16.msra.mxu2 %v2539_v43  ;;  %1525 = vmatpush.bf16.msra.mxu3 %v2543_v46  ;;  %v3061_v43 = vld [vmem:[#allocation7 + $0xec] sm:$0xf]  ;;  %v2643_v46 = vor.u32 %v3066_v36, %v2642_v35 }
  0xbe   :  { %1487 = vmatmul.bf16.vlgmr.msra.gmra.mxu0 %v3577_v20  ;;  %v2655_v52 = vor.u32 %v3061_v43, %v2652_v44 }
  0xbf   :  { %1531 = vmatpush.bf16.msrb.mxu0 %v2883_v47  ;;  %1500 = vmatmul.bf16.vlgmr.msra.gmra.mxu1 %v3577_v20  ;;  %v2647_v47 = vor.u32 %v3060_v37, %v2644_v40 }
  0xc0   :  { %1544 = vmatpush.bf16.msrb.mxu1 %v2887_v48  ;;  %1513 = vmatmul.bf16.vlgmr.msra.gmra.mxu2 %v3577_v20  ;;  %v2651_v48 = vor.u32 %v3067_v42, %v2650_v41  ;;  %v3615_v41 = vld [vmem:[#allocation10] sm:$0xff] }
  0xc1   :  { %1557 = vmatpush.bf16.msrb.mxu2 %v2891_v49  ;;  %1570 = vmatpush.bf16.msrb.mxu3 %v2895_v53  ;;  %v2594_v49 = vld [vmem:[#allocation7 + $0x80] sm:$0xf]  ;;  %v2596_v53 = vld [vmem:[#allocation7 + $0xb0] sm:$0xf0]  ;;  %v1587_v43 = vperm.slane %v3615_v41, 0 }
  0xc2   :  { %1526 = vmatmul.bf16.vlgmr.msra.gmra.mxu3 %v3577_v20 }
  0xc3   :  { %1532 = vmatpush.bf16.msrb.mxu0 %v2835_v59  ;;  %v3591_v56 = vpop.f32.mrf.mxu2  ;;  %v2604_v59 = vld [vmem:[#allocation7 + $0xb8] sm:$0xf0] }
  0xc4   :  { %1545 = vmatpush.bf16.msrb.mxu1 %v2839_v60  ;;  %v2595_v60 = vor.u32 %v3054_v50, %v2594_v49  ;;  %v815_v2 = vpop.f32.mrf.mxu1  ;;  %v2607_v3 = vor.u32 %v3049_v58, %v2604_v59  ;;  %v3239_v59 = vld [vmem:[#allocation11 + $0x78] sm:$0xff] }
  0xc5   :  { %1558 = vmatpush.bf16.msrb.mxu2 %v2843_v61  ;;  %1571 = vmatpush.bf16.msrb.mxu3 %v2847_v1  ;;  %v3593_v57 = vpop.f32.mrf.mxu3  ;;  %v2599_v61 = vor.u32 %v3048_v51, %v2596_v53  ;;  %v3036_v1 = vld [vmem:[#allocation7 + $0x24] sm:$0xf]  ;;  %v1590_v51 = vperm.slane %v3615_v41, 3 }
  0xc6   :  { %v2551_v12 = vor.u32 %v3036_v1, %v2548_v4  ;;  %v3238_v1 = vld [vmem:[#allocation11 + $0x70] sm:$0xff]  ;;  %v3255_v4 = vld [vmem:[#allocation11 + $0xf8] sm:$0xff] }
  0xc7   :  { %1533 = vmatpush.bf16.msrb.mxu0 %v2787_v8  ;;  %v3037_v8 = vld [vmem:[#allocation7 + $0x2c] sm:$0xf] }
  0xc8   :  { %1546 = vmatpush.bf16.msrb.mxu1 %v2791_v9  ;;  %v2556_v9 = vld [vmem:[#allocation7 + $0x58] sm:$0xf0] }
  0xc9   :  { %1559 = vmatpush.bf16.msrb.mxu2 %v2795_v10  ;;  %1572 = vmatpush.bf16.msrb.mxu3 %v2799_v14  ;;  %v802_v10 = vpop.f32.mrf.mxu0  ;;  %v2559_v14 = vor.u32 %v3037_v8, %v2556_v9  ;;  %v3246_v9 = vld [vmem:[#allocation11 + $0xb0] sm:$0xff] }
  0xca   :  { %v3254_v10 = vld [vmem:[#allocation11 + $0xf0] sm:$0xff] }
  0xcb   :  { %1534 = vmatpush.bf16.msrb.mxu0 %v2739_v19  ;;  %v828_v15 = vpop.f32.mrf.mxu2 }
  0xcc   :  { %1547 = vmatpush.bf16.msrb.mxu1 %v2743_v21  ;;  %v3236_v15 = vld [vmem:[#allocation11 + $0x60] sm:$0xff] }
  0xcd   :  { %1560 = vmatpush.bf16.msrb.mxu2 %v2747_v22  ;;  %1573 = vmatpush.bf16.msrb.mxu3 %v2751_v26  ;;  %v841_v16 = vpop.f32.mrf.mxu3 }
  0xcf   :  { %1535 = vmatpush.bf16.msrb.mxu0 %v2691_v32 }
  0xd0   :  { %1548 = vmatpush.bf16.msrb.mxu1 %v2695_v33 }
  0xd1   :  { %1561 = vmatpush.bf16.msrb.mxu2 %v2699_v34  ;;  %1574 = vmatpush.bf16.msrb.mxu3 %v2703_v39 }
  0xd3   :  { %1536 = vmatpush.bf16.msrb.mxu0 %v2643_v46  ;;  %v1588_v46 = vperm.slane %v3615_v41, 1 }
  0xd4   :  { %1549 = vmatpush.bf16.msrb.mxu1 %v2647_v47 }
  0xd5   :  { %1562 = vmatpush.bf16.msrb.mxu2 %v2651_v48  ;;  %1575 = vmatpush.bf16.msrb.mxu3 %v2655_v52  ;;  %v1589_v48 = vperm.slane %v3615_v41, 2 }
  0xd7   :  { %1537 = vmatpush.bf16.msrb.mxu0 %v2595_v60 }
  0xd8   :  { %1550 = vmatpush.bf16.msrb.mxu1 %v2599_v61 }
  0xd9   :  { %1563 = vmatpush.bf16.msrb.mxu2 %v2603_v62  ;;  %1576 = vmatpush.bf16.msrb.mxu3 %v2607_v3  ;;  %v3247_v3 = vld [vmem:[#allocation11 + $0xb8] sm:$0xff] }
  0xdb   :  { %1538 = vmatpush.bf16.msrb.mxu0 %v2547_v11  ;;  %v3599_v17 = vpop.f32.mrf.mxu0 }
  0xdc   :  { %1551 = vmatpush.bf16.msrb.mxu1 %v2551_v12  ;;  %v3601_v18 = vpop.f32.mrf.mxu1 }
  0xdd   :  { %1564 = vmatpush.bf16.msrb.mxu2 %v2555_v13  ;;  %1577 = vmatpush.bf16.msrb.mxu3 %v2559_v14  ;;  %v3228_v14 = vld [vmem:[#allocation11 + $0x20] sm:$0xff] }
  0xde   :  { %1539 = vmatmul.bf16.vlgmr.msrb.gmra.mxu0 %v3577_v20 }
  0xdf   :  { %1552 = vmatmul.bf16.vlgmr.msrb.gmra.mxu1 %v3577_v20 }
  0xe0   :  { %1565 = vmatmul.bf16.vlgmr.msrb.gmra.mxu2 %v3577_v20  ;;  %1578 = vmatmul.bf16.vlgmr.msrb.gmra.mxu3 %v3577_v20 }
  0xe1   :  { %2068 = vmatpush.bf16.msra.mxu1 %v3239_v59  ;;  %2081 = vmatpush.bf16.msra.mxu2 %v3247_v3 }
  0xe2   :  { %2094 = vmatpush.bf16.msra.mxu3 %v3255_v4  ;;  %v3241_v4 = vld [vmem:[#allocation11 + $0x88] sm:$0xff] }
  0xe3   :  { %v3603_v7 = vpop.f32.mrf.mxu2  ;;  %v854_v21 = vpop.f32.mrf.mxu0 }
  0xe4   :  { %v867_v22 = vpop.f32.mrf.mxu1 }
  0xe5   :  { %v3605_v19 = vpop.f32.mrf.mxu3  ;;  %2069 = vmatpush.bf16.msra.mxu1 %v3238_v1  ;;  %2082 = vmatpush.bf16.msra.mxu2 %v3246_v9  ;;  %v1592_v1 = vperm.slane %v3615_v41, 5 }
  0xe6   :  { %2095 = vmatpush.bf16.msra.mxu3 %v3254_v10 }
  0xe9   :  { %2070 = vmatpush.bf16.msra.mxu1 %v3237_v6 }
  0xeb   :  { %v880_v23 = vpop.f32.mrf.mxu2 }
  0xed   :  { %v893_v24 = vpop.f32.mrf.mxu3  ;;  %2071 = vmatpush.bf16.msra.mxu1 %v3236_v15 }
  0xee   :  { %v3245_v24 = vld [vmem:[#allocation11 + $0xa8] sm:$0xff] }
  0xef   :  { %2083 = vmatpush.bf16.msra.mxu2 %v3245_v24 }
  0xfb   :  { %v3607_v25 = vpop.f32.mrf.mxu0 }
  0xfc   :  { %v3609_v26 = vpop.f32.mrf.mxu1 }
 0x103   :  { %v3611_v27 = vpop.f32.mrf.mxu2  ;;  %v906_v20 = vpop.f32.mrf.mxu0 }
 0x104   :  { %v919_v29 = vpop.f32.mrf.mxu1  ;;  %v3253_v20 = vld [vmem:[#allocation11 + $0xe8] sm:$0xff] }
 0x105   :  { %v3613_v28 = vpop.f32.mrf.mxu3  ;;  %2096 = vmatpush.bf16.msra.mxu3 %v3253_v20 }
 0x10b   :  { %v932_v30 = vpop.f32.mrf.mxu2 }
 0x10c   :  { %v3227_v30 = vld [vmem:[#allocation11 + $0x18] sm:$0xff] }
 0x10d   :  { %v945_v31 = vpop.f32.mrf.mxu3 }
 0x10e   :  { %v3235_v31 = vld [vmem:[#allocation11 + $0x58] sm:$0xff] }
 0x10f   :  { %2072 = vmatpush.bf16.msra.mxu1 %v3235_v31 }
 0x11b   :  { %v1436_v32 = vpop.f32.mrf.mxu0 }
 0x11c   :  { %v1449_v33 = vpop.f32.mrf.mxu1  ;;  %v1437_v42 = vadd.f32 %v1436_v32, %v3589_v45 }
 0x11d   :  { %v1450_v44 = vadd.f32 %v1449_v33, %v3587_v38  ;;  %v3231_v38 = vld [vmem:[#allocation11 + $0x38] sm:$0xff]  ;;  %v3244_v33 = vld [vmem:[#allocation11 + $0xa0] sm:$0xff] }
 0x11e   :  { %v1611_v49 = vadd.f32 %v1587_v43, %v1437_v42  ;;  %2055 = vmatpush.bf16.msra.mxu0 %v3231_v38  ;;  %2084 = vmatpush.bf16.msra.mxu2 %v3244_v33  ;;  %v3224_v38 = vld [vmem:[#allocation11] sm:$0xff] }
 0x11f   :  { %v1612_v53 = vadd.f32 %v1588_v46, %v1450_v44  ;;  %v3225_v46 = vld [vmem:[#allocation11 + $0x8] sm:$0xff] }
 0x120   :  { %v2896_v55 = vmul.f32 -1.442695, %v1611_v49 }
 0x121   :  { %v2897_v60 = vmul.f32 -1.442695, %v1612_v53 }
 0x122   :  { %3268 = vpow2.f32 %v2896_v55  ;;  %2056 = vmatpush.bf16.msra.mxu0 %v3230_v0  ;;  %v3242_v55 = vld [vmem:[#allocation11 + $0x90] sm:$0xff]  ;;  %v3232_v0 = vld [vmem:[#allocation11 + $0x40] sm:$0xff] }
 0x123   :  { %v1462_v34 = vpop.f32.mrf.mxu2  ;;  %v1438_v36 = vpop.f32.mrf.mxu0  ;;  %3270 = vpow2.f32 %v2897_v60 }
 0x124   :  { %v1451_v37 = vpop.f32.mrf.mxu1  ;;  %v1463_v47 = vadd.f32 %v1462_v34, %v3591_v56  ;;  %v3252_v34 = vld [vmem:[#allocation11 + $0xe0] sm:$0xff]  ;;  %v3234_v36 = vld [vmem:[#allocation11 + $0x50] sm:$0xff] }
 0x125   :  { %v1475_v35 = vpop.f32.mrf.mxu3  ;;  %2097 = vmatpush.bf16.msra.mxu3 %v3252_v34  ;;  %v3645_v37 = vld [vmem:[#allocation10 + $0x8] sm:$0xf]  ;;  %2073 = vmatpush.bf16.msra.mxu1 %v3234_v36 }
 0x126   :  { %v1476_v50 = vadd.f32 %v1475_v35, %v3593_v57  ;;  %v1613_v45 = vadd.f32 %v1589_v48, %v1463_v47  ;;  %2057 = vmatpush.bf16.msra.mxu0 %v3229_v5  ;;  %v3226_v35 = vld [vmem:[#allocation11 + $0x10] sm:$0xff]  ;;  %v1595_v44 = vperm.slane %v3645_v37, 0  ;;  %v3233_v47 = vld [vmem:[#allocation11 + $0x48] sm:$0xff]  ;;  %v1596_v49 = vperm.slane %v3645_v37, 1 }
 0x127   :  { %v3249_v5 = vld [vmem:[#allocation11 + $0xc8] sm:$0xff] }
 0x128   :  { %v1614_v58 = vadd.f32 %v1590_v51, %v1476_v50  ;;  %v2898_v56 = vmul.f32 -1.442695, %v1613_v45  ;;  %v3269_v8 = vpop.eup %3268 }
 0x129   :  { %v3271_v11 = vpop.eup %3270  ;;  %v3633_v21 = vadd.f32 1.0, %v3269_v8  ;;  %2074 = vmatpush.bf16.msra.mxu1 %v3233_v47 }
 0x12a   :  { %v2899_v57 = vmul.f32 -1.442695, %v1614_v58  ;;  %3272 = vpow2.f32 %v2898_v56  ;;  %v3635_v23 = vadd.f32 1.0, %v3271_v11  ;;  %2058 = vmatpush.bf16.msra.mxu0 %v3228_v14  ;;  %v3250_v58 = vld [vmem:[#allocation11 + $0xd0] sm:$0xff]  ;;  %v1598_v14 = vperm.slane %v3645_v37, 3 }
 0x12b   :  { %v1464_v39 = vpop.f32.mrf.mxu2  ;;  %vm1644_vm0 = vweird.f32 %v3633_v21  ;;  %v1650_v36 = vand.u32 2147483648, %v3633_v21 }
 0x12c   :  { %3274 = vpow2.f32 %v2899_v57  ;;  %v3243_v39 = vld [vmem:[#allocation11 + $0x98] sm:$0xff]  ;;  %v1591_v57 = vperm.slane %v3615_v41, 4  ;;  %vm1659_vm1 = vweird.f32 %v3635_v23 }
 0x12d   :  { %v1477_v40 = vpop.f32.mrf.mxu3  ;;  %3276 = vrcp.f32 %v3633_v21  ;;  %2085 = vmatpush.bf16.msra.mxu2 %v3243_v39  ;;  %2075 = vmatpush.bf16.msra.mxu1 %v3232_v0 }
 0x12e   :  { %3278 = vrcp.f32 %v3635_v23  ;;  %2059 = vmatpush.bf16.msra.mxu0 %v3227_v30  ;;  %v3251_v40 = vld [vmem:[#allocation11 + $0xd8] sm:$0xff] }
 0x12f   :  { %2098 = vmatpush.bf16.msra.mxu3 %v3251_v40  ;;  %v1663_v40 = vand.u32 2147483647, %v3635_v23 }
 0x130   :  { %v3273_v16 = vpop.eup %3272 }
 0x131   :  { %v3637_v29 = vadd.f32 1.0, %v3273_v16  ;;  %2086 = vmatpush.bf16.msra.mxu2 %v3242_v55  ;;  %v1651_v55 = vor.u32 1.1754944e-38, %v1650_v36  ;;  %vm1664_vm12 = vcmp.eq.f32.partialorder %v1663_v40, 8.507059e+37 }
 0x132   :  { %v3275_v22 = vpop.eup %3274  ;;  %2060 = vmatpush.bf16.msra.mxu0 %v3226_v35 }
 0x133   :  { %v3640_v32 = vadd.f32 1.0, %v3275_v22  ;;  %3280 = vrcp.f32 %v3637_v29  ;;  %v3647_v42 = vpop.eup %3276  ;;  %2099 = vmatpush.bf16.msra.mxu3 %v3250_v58  ;;  %v1665_v58 = vand.u32 2147483648, %v3635_v23  ;;  %v1680_v0 = vand.u32 2147483648, %v3637_v29 }
 0x134   :  { %v3649_v43 = vpop.eup %3278  ;;  %v1640_v51 = vmul.f32 %v3647_v42, %v3633_v21  ;;  %vm1645_vm2 = vweird.f32 %v3647_v42  ;;  %vm1674_vm8 = vweird.f32 %v3637_v29 }
 0x135   :  { %3282 = vrcp.f32 %v3640_v32  ;;  %v1655_v60 = vmul.f32 %v3649_v43, %v3635_v23  ;;  %2087 = vmatpush.bf16.msra.mxu2 %v3241_v4  ;;  %vm1660_vm3 = vweird.f32 %v3649_v43  ;;  %vm3705_vm4 = vmor %vm1644_vm0, %vm1645_vm2  ;;  %v1695_v23 = vand.u32 2147483648, %v3640_v32 }
 0x136   :  { %2061 = vmatpush.bf16.msra.mxu0 %v3225_v46  ;;  %v1641_v8 = vsub.f32 1.0, %v1640_v51  ;;  %vm3720_vm6 = vmor %vm1659_vm1, %vm1660_vm3  ;;  %vm1689_vm11 = vweird.f32 %v3640_v32 }
 0x137   :  { %v1656_v10 = vsub.f32 1.0, %v1655_v60  ;;  %2100 = vmatpush.bf16.msra.mxu3 %v3249_v5 }
 0x138   :  { %v1642_v31 = vmul.f32 %v3647_v42, %v1641_v8 }
 0x139   :  { %v3653_v50 = vpop.eup %3280 }
 0x13a   :  { %2062 = vmatpush.bf16.msra.mxu0 %v3224_v38  ;;  %v1643_v47 = vadd.f32 %v3647_v42, %v1642_v31  ;;  %vm1675_vm5 = vweird.f32 %v3653_v50 }
 0x13b   :  { %v3625_v52 = vpop.f32.mrf.mxu0  ;;  %v3658_v59 = vpop.eup %3282  ;;  %vm3737_vm10 = vmor %vm1674_vm8, %vm1675_vm5 }
 0x13c   :  { %v3627_v54 = vpop.f32.mrf.mxu1  ;;  %v1489_v56 = vadd.f32 %v3625_v52, %v3599_v17  ;;  %v1670_v17 = vmul.f32 %v3653_v50, %v3637_v29  ;;  %vm1690_vm7 = vweird.f32 %v3658_v59 }
 0x13d   :  { %vm3748_vm13 = vmor %vm1689_vm11, %vm1690_vm7 }
 0x13e   :  { %v1615_v11 = vadd.f32 %v1591_v57, %v1489_v56  ;;  %v1671_v15 = vsub.f32 1.0, %v1670_v17 }
 0x143   :  { %v3629_v61 = vpop.f32.mrf.mxu2  ;;  %v1490_v63 = vpop.f32.mrf.mxu0 }
 0x144   :  { %v1503_v2 = vpop.f32.mrf.mxu1  ;;  %v1515_v52 = vadd.f32 %v3629_v61, %v3603_v7  ;;  %v1648_v7 = vand.u32 2147483647, %v3633_v21  ;;  %v1681_v21 = vor.u32 1.1754944e-38, %v1680_v0 }
 0x145   :  { %v3631_v62 = vpop.f32.mrf.mxu3  ;;  %v1593_v2 = vperm.slane %v3615_v41, 6 }
 0x146   :  { %vm1649_vm9 = vcmp.eq.f32.partialorder %v1648_v7, 8.507059e+37 }
 0x147   :  { %v1617_v16 = vadd.f32 %v1593_v2, %v1515_v52  ;;  %v1647_v2 = vsel %vm3705_vm4, %v3647_v42, %v1643_v47  ;;  %v1678_v42 = vand.u32 2147483647, %v3637_v29 }
 0x149   :  { %vm1679_vm14 = vcmp.eq.f32.partialorder %v1678_v42, 8.507059e+37 }
 0x14b   :  { %v1516_v12 = vpop.f32.mrf.mxu2 }
 0x14d   :  { %v1529_v13 = vpop.f32.mrf.mxu3 }
 0x14e   :  { %v1597_v13 = vperm.slane %v3645_v37, 2  ;;  %v1657_v37 = vmul.f32 %v3649_v43, %v1656_v10 }
 0x15b   :  { %v1540_v48 = vpop.f32.mrf.mxu0 }
 0x15c   :  { %v1541_v53 = vadd.f32 %v1540_v48, %v3607_v25  ;;  %v1553_v45 = vpop.f32.mrf.mxu1  ;;  %v1502_v25 = vadd.f32 %v3627_v54, %v3601_v18  ;;  %v1685_v18 = vmul.f32 %v3658_v59, %v3640_v32  ;;  %v1528_v54 = vadd.f32 %v3631_v62, %v3605_v19  ;;  %v3240_v19 = vld [vmem:[#allocation11 + $0x80] sm:$0xff] }
 0x15d   :  { %v1554_v63 = vadd.f32 %v1553_v45, %v3609_v26  ;;  %v1594_v26 = vperm.slane %v3615_v41, 7  ;;  %v3248_v62 = vld [vmem:[#allocation11 + $0xc0] sm:$0xff]  ;;  %2088 = vmatpush.bf16.msra.mxu2 %v3240_v19 }
 0x15e   :  { %v1619_v3 = vadd.f32 %v1595_v44, %v1541_v53  ;;  %v1616_v41 = vadd.f32 %v1592_v1, %v1502_v25  ;;  %v1686_v30 = vsub.f32 1.0, %v1685_v18  ;;  %2101 = vmatpush.bf16.msra.mxu3 %v3248_v62  ;;  %v1672_v44 = vmul.f32 %v3653_v50, %v1671_v15 }
 0x15f   :  { %v1620_v6 = vadd.f32 %v1596_v49, %v1554_v63  ;;  %v1618_v33 = vadd.f32 %v1594_v26, %v1528_v54  ;;  %v1658_v53 = vadd.f32 %v3649_v43, %v1657_v37  ;;  %v1666_v26 = vor.u32 1.1754944e-38, %v1665_v58 }
 0x160   :  { %v2900_v9 = vmul.f32 -1.442695, %v1619_v3  ;;  %v1687_v48 = vmul.f32 %v3658_v59, %v1686_v30  ;;  %v1673_v63 = vadd.f32 %v3653_v50, %v1672_v44  ;;  %v1652_v18 = vsel %vm1649_vm9, %v1651_v55, %v1647_v2 }
 0x161   :  { %v2901_v12 = vmul.f32 -1.442695, %v1620_v6  ;;  %v1662_v17 = vsel %vm3720_vm6, %v3649_v43, %v1658_v53  ;;  %v1693_v43 = vand.u32 2147483647, %v3640_v32 }
 0x162   :  { %3284 = vpow2.f32 %v2900_v9  ;;  %v1688_v4 = vadd.f32 %v3658_v59, %v1687_v48  ;;  %v1677_v29 = vsel %vm3737_vm10, %v3653_v50, %v1673_v63  ;;  %v1696_v50 = vor.u32 1.1754944e-38, %v1695_v23 }
 0x163   :  { %v1566_v61 = vpop.f32.mrf.mxu2  ;;  %3286 = vpow2.f32 %v2901_v12  ;;  %v1579_v24 = vpop.f32.mrf.mxu3  ;;  %vm1694_vm15 = vcmp.eq.f32.partialorder %v1693_v43, 8.507059e+37 }
 0x164   :  { %v1567_v22 = vadd.f32 %v1566_v61, %v3611_v27  ;;  %v1542_v20 = vpop.f32.mrf.mxu0  ;;  %v1580_v34 = vadd.f32 %v1579_v24, %v3613_v28  ;;  %v1555_v35 = vpop.f32.mrf.mxu1  ;;  %3288 = vtanh.f32 %v1615_v11  ;;  %v1667_v11 = vsel %vm1664_vm12, %v1666_v26, %v1662_v17 }
 0x165   :  { %3290 = vtanh.f32 %v1616_v41  ;;  %v1692_v32 = vsel %vm3748_vm13, %v3658_v59, %v1688_v4 }
 0x166   :  { %v1621_v39 = vadd.f32 %v1597_v13, %v1567_v22  ;;  %v1622_v27 = vadd.f32 %v1598_v14, %v1580_v34  ;;  %3292 = vtanh.f32 %v1617_v16  ;;  %v1682_v14 = vsel %vm1679_vm14, %v1681_v21, %v1677_v29 }
 0x167   :  { %3294 = vtanh.f32 %v1618_v33  ;;  %v1697_v15 = vsel %vm1694_vm15, %v1696_v50, %v1692_v32 }
 0x168   :  { %v2902_v28 = vmul.f32 -1.442695, %v1621_v39  ;;  %v3285_v46 = vpop.eup %3284  ;;  %v2903_v49 = vmul.f32 -1.442695, %v1622_v27 }
 0x169   :  { %v3287_v51 = vpop.eup %3286  ;;  %v3696_v45 = vadd.f32 1.0, %v3285_v46 }
 0x16a   :  { %3296 = vpow2.f32 %v2902_v28  ;;  %v3699_v38 = vadd.f32 1.0, %v3287_v51  ;;  %v3289_v56 = vpop.eup %3288 }
 0x16b   :  { %3298 = vpow2.f32 %v2903_v49  ;;  %v1568_v60 = vpop.f32.mrf.mxu2  ;;  %v1581_v25 = vpop.f32.mrf.mxu3  ;;  %v1779_v10 = vmul.f32 %v3289_v56, %v1652_v18  ;;  %v1728_v20 = vand.u32 2147483647, %v3696_v45  ;;  %v1730_v30 = vand.u32 2147483648, %v3696_v45 }
 0x16c   :  { %3300 = vrcp.f32 %v3696_v45  ;;  %v3291_v1 = vpop.eup %3290  ;;  %v1743_v33 = vand.u32 2147483647, %v3699_v38  ;;  %v1745_v34 = vand.u32 2147483648, %v3699_v38  ;;  %vm1724_vm2 = vweird.f32 %v3696_v45 }
 0x16d   :  { %3302 = vrcp.f32 %v3699_v38  ;;  %v3293_v5 = vpop.eup %3292  ;;  %v1780_v7 = vmul.f32 %v3291_v1, %v1667_v11  ;;  %vm1739_vm3 = vweird.f32 %v3699_v38  ;;  %vm1729_vm5 = vcmp.eq.f32.partialorder %v1728_v20, 8.507059e+37  ;;  %v3267_v11 = vld [vmem:[%s3790_s6] ss:$0 sm:$0xff] }
 0x16e   :  { %v3295_v52 = vpop.eup %3294  ;;  %v1781_v62 = vmul.f32 %v3293_v5, %v1682_v14  ;;  %v1731_v27 = vor.u32 1.1754944e-38, %v1730_v30  ;;  %vm1744_vm7 = vcmp.eq.f32.partialorder %v1743_v33, 8.507059e+37  ;;  %v1746_v48 = vor.u32 1.1754944e-38, %v1745_v34 }
 0x16f   :  { %v1782_v59 = vmul.f32 %v3295_v52, %v1697_v15 }
 0x170   :  { %v3297_v8 = vpop.eup %3296 }
 0x171   :  { %v3299_v9 = vpop.eup %3298  ;;  %v3755_v12 = vadd.f32 1.0, %v3297_v8 }
 0x172   :  { %v3301_v13 = vpop.eup %3300  ;;  %v3757_v41 = vadd.f32 1.0, %v3299_v9 }
 0x173   :  { %v3303_v61 = vpop.eup %3302  ;;  %v1720_v19 = vmul.f32 %v3301_v13, %v3696_v45  ;;  %3304 = vrcp.f32 %v3755_v12  ;;  %vm1725_vm0 = vweird.f32 %v3301_v13  ;;  %v1758_v55 = vand.u32 2147483647, %v3755_v12 }
 0x174   :  { %v1735_v16 = vmul.f32 %v3303_v61, %v3699_v38  ;;  %3306 = vrcp.f32 %v3757_v41  ;;  %vm1740_vm1 = vweird.f32 %v3303_v61  ;;  %vm1726_vm4 = vmor %vm1724_vm2, %vm1725_vm0  ;;  %v1760_v56 = vand.u32 2147483648, %v3755_v12 }
 0x175   :  { %3308 = vtanh.f32 %v1779_v10  ;;  %v1721_v22 = vsub.f32 1.0, %v1720_v19  ;;  %vm1741_vm6 = vmor %vm1739_vm3, %vm1740_vm1  ;;  %v1775_v25 = vand.u32 2147483648, %v3757_v41  ;;  %v1773_v4 = vand.u32 2147483647, %v3757_v41 }
 0x176   :  { %3310 = vtanh.f32 %v1780_v7  ;;  %v1736_v24 = vsub.f32 1.0, %v1735_v16  ;;  %vm1754_vm10 = vweird.f32 %v3755_v12  ;;  %v1761_v42 = vor.u32 1.1754944e-38, %v1760_v56 }
 0x177   :  { %v1722_v31 = vmul.f32 %v3301_v13, %v1721_v22  ;;  %3312 = vtanh.f32 %v1781_v62  ;;  %vm1769_vm12 = vweird.f32 %v3757_v41  ;;  %vm1759_vm13 = vcmp.eq.f32.partialorder %v1758_v55, 8.507059e+37 }
 0x178   :  { %v1737_v35 = vmul.f32 %v3303_v61, %v1736_v24  ;;  %3314 = vtanh.f32 %v1782_v59  ;;  %v1776_v26 = vor.u32 1.1754944e-38, %v1775_v25  ;;  %vm1774_vm15 = vcmp.eq.f32.partialorder %v1773_v4, 8.507059e+37 }
 0x179   :  { %v3305_v36 = vpop.eup %3304  ;;  %v1723_v37 = vadd.f32 %v3301_v13, %v1722_v31 }
 0x17a   :  { %v3307_v39 = vpop.eup %3306  ;;  %v1750_v40 = vmul.f32 %v3305_v36, %v3755_v12  ;;  %v1738_v44 = vadd.f32 %v3303_v61, %v1737_v35  ;;  %vm1755_vm8 = vweird.f32 %v3305_v36 }
 0x17b   :  { %v3309_v28 = vpop.eup %3308  ;;  %v1765_v46 = vmul.f32 %v3307_v39, %v3757_v41  ;;  %v1727_v47 = vsel %vm1726_vm4, %v3301_v13, %v1723_v37  ;;  %vm1770_vm9 = vweird.f32 %v3307_v39  ;;  %vm1756_vm11 = vmor %vm1754_vm10, %vm1755_vm8 }
 0x17c   :  { %v3311_v49 = vpop.eup %3310  ;;  %v1751_v51 = vsub.f32 1.0, %v1750_v40  ;;  %v1732_v53 = vsel %vm1729_vm5, %v1731_v27, %v1727_v47  ;;  %v1742_v45 = vsel %vm1741_vm6, %v3303_v61, %v1738_v44  ;;  %vm1771_vm14 = vmor %vm1769_vm12, %vm1770_vm9 }
 0x17d   :  { %v1766_v58 = vsub.f32 1.0, %v1765_v46  ;;  %v1787_v38 = vmul.f32 %v3309_v28, %v1732_v53  ;;  %v1747_v60 = vsel %vm1744_vm7, %v1746_v48, %v1742_v45  ;;  %v3313_v57 = vpop.eup %3312 }
 0x17e   :  { %v1788_v63 = vmul.f32 %v3311_v49, %v1747_v60  ;;  %v1752_v0 = vmul.f32 %v3305_v36, %v1751_v51  ;;  %v3315_v1 = vpop.eup %3314 }
 0x17f   :  { %v1791_v2 = vpack.c.bf16 %v1787_v38, %v1787_v38  ;;  %v1767_v3 = vmul.f32 %v3307_v39, %v1766_v58 }
 0x180   :  { %v1792_v5 = vpack.c.bf16 %v1788_v63, %v1788_v63  ;;  %v1753_v17 = vadd.f32 %v3305_v36, %v1752_v0 }
 0x181   :  { %2063 = vmatmul.bf16.vlgmr.msra.gmra.mxu0 %v1791_v2  ;;  %v1768_v23 = vadd.f32 %v3307_v39, %v1767_v3 }
 0x182   :  { %2076 = vmatmul.bf16.vlgmr.msra.gmra.mxu1 %v1792_v5  ;;  %v1757_v52 = vsel %vm1756_vm11, %v3305_v36, %v1753_v17 }
 0x183   :  { %v1762_v6 = vsel %vm1759_vm13, %v1761_v42, %v1757_v52  ;;  %v1772_v43 = vsel %vm1771_vm14, %v3307_v39, %v1768_v23 }
 0x184   :  { %v1789_v8 = vmul.f32 %v3313_v57, %v1762_v6  ;;  %v1777_v18 = vsel %vm1774_vm15, %v1776_v26, %v1772_v43 }
 0x185   :  { %v1790_v29 = vmul.f32 %v3315_v1, %v1777_v18 }
 0x186   :  { %v1793_v21 = vpack.c.bf16 %v1789_v8, %v1789_v8 }
 0x187   :  { %v1794_v54 = vpack.c.bf16 %v1790_v29, %v1790_v29 }
 0x188   :  { %2089 = vmatmul.bf16.vlgmr.msra.gmra.mxu2 %v1793_v21 }
 0x189   :  { %2102 = vmatmul.bf16.vlgmr.msra.gmra.mxu3 %v1794_v54 }
 0x1fe   :  { %v2064_v9 = vpop.f32.mrf.mxu0 }
 0x1ff   :  { %v2077_v10 = vpop.f32.mrf.mxu1  ;;  %v2065_v32 = vadd.f32 %v3267_v11, %v2064_v9 }
 0x201   :  { %v2078_v7 = vadd.f32 %v2077_v10, %v2065_v32 }
 0x206   :  { %v2066_v12 = vpop.f32.mrf.mxu0 }
 0x207   :  { %v2079_v13 = vpop.f32.mrf.mxu1 }
 0x20b   :  { %v2090_v50 = vpop.f32.mrf.mxu2 }
 0x20c   :  { %v2091_v41 = vadd.f32 %v2090_v50, %v2078_v7  ;;  %v2103_v61 = vpop.f32.mrf.mxu3 }
 0x20e   :  { %v2104_v14 = vadd.f32 %v2103_v61, %v2091_v41 }
 0x210   :  { %2107 = vst [vmem:[#allocation13] sm:$0x3] %v2104_v14 }
 0x211   :  { %2118 = dma.vmem_to_hbm [thread:$0]  %s2114_s9, 32, %s2116_s12, [#allocation4]  }
 0x213   :  { %v2092_v19 = vpop.f32.mrf.mxu2 }
 0x214   :  { %v2105_v62 = vpop.f32.mrf.mxu3 }
 0x215   :  { %3492 = dma.done.wait [#allocation4], 32  }
 0x216   :  { %3493 = vsyncadd [#allocation4], 4294967264 }
 0x217   :  { %2123 = vsyncpa [#allocation3], 1 }
 0x218   :  { %2124 = vsyncpa [#allocation6], 1 }
 0x219   :  { %2125 = vsyncpa [#allocation9], 1 }
 0x21a   :  { %2126 = vsyncpa [#allocation12], 1 }
 0x21b   :  { %2127 = vsyncpa [#allocation4], 1 }

</bundles_post_ra>
